<compile_context>
chip_gen: v7x
topology: tpu7x:2x2x1
jax: 0.10.0
libtpu: 0.0.40
codegen_flags: <defaults>
</compile_context>

<pallas_src>
import math

import jax
import jax.numpy as jnp
from jax import lax
from jax.experimental import pallas as pl
from jax.experimental.pallas import tpu as pltpu


def _layer_norm(x, gamma, beta, eps=1e-5):
    mu = jnp.mean(x, axis=-1, keepdims=True)
    var = jnp.mean((x - mu) ** 2, axis=-1, keepdims=True)
    return (x - mu) * lax.rsqrt(var + eps) * gamma + beta


# (h, M, C) x (h, C, N) -> (h, M, N)   : batched projection / PV / output proj
_PROJ_DN = (((2,), (1,)), ((0,), (0,)))
# (h, Q, d) x (h, K, d) -> (h, Q, K)   : QK^T without an explicit transpose
_SCORE_DN = (((2,), (2,)), ((0,), (0,)))


def refine_textual_kernel(
    vis_ref, txt_kv_ref, txt_q_ref,
    wq_ref, bq_ref, wk_ref, bk_ref, wv_ref, bv_ref, wo_ref, bo_ref,
    g1_ref, be1_ref,          # LayerNorm inside MultiHeadAttention
    g2_ref, be2_ref,          # LayerNorm of RefineTextualLayer
    w1_ref, b1_ref, w2_ref, b2_ref,
    g3_ref, be3_ref,          # LayerNorm inside PositionWiseFeedForward
    out_ref,
):
    f32 = jnp.float32
    bf16 = jnp.bfloat16

    vis = vis_ref[...]        # (TQ, D) f32  -- query tile of `visual`
    txt_kv = txt_kv_ref[...]  # (S,  D) f32  -- full textual sequence (K/V source)
    txt_q = txt_q_ref[...]    # (TQ, D) f32  -- textual at query positions (residual)

    h = wq_ref.shape[0]
    tq, d_model = vis.shape
    s_kv = txt_kv.shape[0]

    # ---- head-major batched projections (MXU, bf16 in / f32 acc) ----
    # 1/sqrt(d_k) is already folded into wq/bq in the wrapper.
    vis_b = jnp.broadcast_to(vis.astype(bf16)[None], (h, tq, d_model))
    txt_b = jnp.broadcast_to(txt_kv.astype(bf16)[None], (h, s_kv, d_model))

    q = lax.dot_general(vis_b, wq_ref[...], _PROJ_DN, preferred_element_type=f32) + bq_ref[...]
    k = lax.dot_general(txt_b, wk_ref[...], _PROJ_DN, preferred_element_type=f32) + bk_ref[...]
    v = lax.dot_general(txt_b, wv_ref[...], _PROJ_DN, preferred_element_type=f32) + bv_ref[...]
    # q: (h, TQ, d_k)   k: (h, S, d_k)   v: (h, S, d_v)

    # ---- scaled dot-product attention, all heads batched ----
    scores = lax.dot_general(q.astype(bf16), k.astype(bf16), _SCORE_DN,
                             preferred_element_type=f32)            # (h, TQ, S)
    scores = scores - jnp.max(scores, axis=-1, keepdims=True)
    p = jnp.exp(scores)                                             # f32, EUP
    p = p * pl.reciprocal(jnp.sum(p, axis=-1, keepdims=True), approx=True)

    av = lax.dot_general(p.astype(bf16), v.astype(bf16), _PROJ_DN,
                         preferred_element_type=f32)                # (h, TQ, d_v)

    # ---- output projection: head concat folded into batched matmul + sum over heads ----
    oh = lax.dot_general(av.astype(bf16), wo_ref[...], _PROJ_DN,
                         preferred_element_type=f32)                # (h, TQ, D)
    att = jnp.sum(oh, axis=0) + bo_ref[...]                         # (TQ, D)

    # ---- MHA internal residual + LayerNorm (residual with queries = visual) ----
    mha_out = _layer_norm(vis + att, g1_ref[...], be1_ref[...])

    # ---- RefineTextualLayer residual + LayerNorm (residual with textual) ----
    ref_txt = _layer_norm(mha_out + txt_q, g2_ref[...], be2_ref[...])

    # ---- PositionWiseFeedForward ----
    h1 = jnp.dot(ref_txt.astype(bf16), w1_ref[...], preferred_element_type=f32) + b1_ref[...]
    h1 = jnp.maximum(h1, 0.0)
    h2 = jnp.dot(h1.astype(bf16), w2_ref[...], preferred_element_type=f32) + b2_ref[...]
    out_ref[...] = _layer_norm(ref_txt + h2, g3_ref[...], be3_ref[...]).astype(out_ref.dtype)


def refine_textual_layer(visual, textual, params, *, h, d_k, d_v):
    B, S, D = visual.shape
    d_ff = params["w1"].shape[1]
    bf16 = jnp.bfloat16

    # Query-tile size: lane/sublane friendly; falls back to whole sequence.
    tq = 128 if S % 128 == 0 else S
    n_q = S // tq

    # ---- wrapper-side weight repacking (plain JAX, once per call) ----
    scale = 1.0 / math.sqrt(d_k)
    wq3 = (jnp.transpose(params["wq"].reshape(D, h, d_k), (1, 0, 2)) * scale).astype(bf16)
    bq3 = params["bq"].reshape(h, 1, d_k) * scale
    wk3 = jnp.transpose(params["wk"].reshape(D, h, d_k), (1, 0, 2)).astype(bf16)
    bk3 = params["bk"].reshape(h, 1, d_k)
    wv3 = jnp.transpose(params["wv"].reshape(D, h, d_v), (1, 0, 2)).astype(bf16)
    bv3 = params["bv"].reshape(h, 1, d_v)
    wo3 = params["wo"].reshape(h, d_v, D).astype(bf16)
    w1 = params["w1"].astype(bf16)
    w2 = params["w2"].astype(bf16)

    def qtile_spec():
        return pl.BlockSpec((pl.Squeezed(), tq, D), lambda b, qi: (b, qi, 0))

    def const_spec(shape):
        nd = len(shape)
        # Constant-index parameters: single-buffered (no pointless double-buffer DMA/VMEM).
        return pl.BlockSpec(shape, lambda b, qi: (0,) * nd, pipeline_mode=pl.Buffered(1))

    in_specs = [
        qtile_spec(),                                                    # visual (query tile)
        pl.BlockSpec((pl.Squeezed(), S, D), lambda b, qi: (b, 0, 0)),    # textual, full seq (K/V)
        qtile_spec(),                                                    # textual, query tile (residual)
        const_spec((h, D, d_k)), const_spec((h, 1, d_k)),                # Wq, bq (scale folded)
        const_spec((h, D, d_k)), const_spec((h, 1, d_k)),                # Wk, bk
        const_spec((h, D, d_v)), const_spec((h, 1, d_v)),                # Wv, bv
        const_spec((h, d_v, D)), const_spec((1, D)),                     # Wo, bo
        const_spec((1, D)), const_spec((1, D)),                          # LN1 gamma, beta
        const_spec((1, D)), const_spec((1, D)),                          # LN2 gamma, beta
        const_spec((D, d_ff)), const_spec((1, d_ff)),                    # W1, b1
        const_spec((d_ff, D)), const_spec((1, D)),                       # W2, b2
        const_spec((1, D)), const_spec((1, D)),                          # LN3 gamma, beta
    ]

    # ---- advisory cost estimate ----
    hdk, hdv = h * d_k, h * d_v
    flops = 2 * B * S * D * (2 * hdk + hdv)          # Q/K/V projections
    flops += 2 * B * h * S * S * (d_k + d_v)         # QK^T + PV
    flops += 2 * B * S * hdv * D                     # output projection
    flops += 4 * B * S * D * d_ff                    # FFN
    transcendentals = B * h * S * S + 3 * B * S
    weight_bytes = 2 * (2 * D * hdk + D * hdv + hdv * D + 2 * D * d_ff)
    bias_bytes = 4 * (2 * hdk + hdv + 8 * D + d_ff)
    bytes_accessed = 4 * B * S * D * 3 + weight_bytes + bias_bytes

    return pl.pallas_call(
        refine_textual_kernel,
        out_shape=jax.ShapeDtypeStruct((B, S, D), jnp.float32),
        grid_spec=pltpu.PrefetchScalarGridSpec(
            num_scalar_prefetch=0,
            grid=(B, n_q),
            in_specs=in_specs,
            out_specs=pl.BlockSpec((pl.Squeezed(), tq, D), lambda b, qi: (b, qi, 0)),
        ),
        compiler_params=pltpu.CompilerParams(
            dimension_semantics=("parallel", "parallel"),
            vmem_limit_bytes=64 * 1024 * 1024,
        ),
        cost_estimate=pl.CostEstimate(
            flops=flops,
            transcendentals=transcendentals,
            bytes_accessed=bytes_accessed,
        ),
    )(
        visual, textual, textual,
        wq3, bq3, wk3, bk3, wv3, bv3, wo3, params["bo"],
        params["g1"], params["be1"], params["g2"], params["be2"],
        w1, params["b1"], w2, params["b2"],
        params["g3"], params["be3"],
    )


def init_params(key, d_model, d_k, d_v, h, d_ff):
    ks = jax.random.split(key, 8)
    scale = 0.02
    return {
        "wq": jax.random.normal(ks[0], (d_model, h * d_k), jnp.float32) * scale,
        "bq": jnp.zeros((1, h * d_k), jnp.float32),
        "wk": jax.random.normal(ks[1], (d_model, h * d_k), jnp.float32) * scale,
        "bk": jnp.zeros((1, h * d_k), jnp.float32),
        "wv": jax.random.normal(ks[2], (d_model, h * d_v), jnp.float32) * scale,
        "bv": jnp.zeros((1, h * d_v), jnp.float32),
        "wo": jax.random.normal(ks[3], (h * d_v, d_model), jnp.float32) * scale,
        "bo": jnp.zeros((1, d_model), jnp.float32),
        "g1": jnp.ones((1, d_model), jnp.float32),
        "be1": jnp.zeros((1, d_model), jnp.float32),
        "g2": jnp.ones((1, d_model), jnp.float32),
        "be2": jnp.zeros((1, d_model), jnp.float32),
        "w1": jax.random.normal(ks[4], (d_model, d_ff), jnp.float32) * scale,
        "b1": jnp.zeros((1, d_ff), jnp.float32),
        "w2": jax.random.normal(ks[5], (d_ff, d_model), jnp.float32) * scale,
        "b2": jnp.zeros((1, d_model), jnp.float32),
        "g3": jnp.ones((1, d_model), jnp.float32),
        "be3": jnp.zeros((1, d_model), jnp.float32),
    }


if __name__ == "__main__":
    B, S, D = 2, 8, 32
    H, DK, DV, DFF = 4, 8, 8, 64

    key = jax.random.PRNGKey(0)
    k_vis, k_txt, k_par = jax.random.split(key, 3)
    visual = jax.random.normal(k_vis, (B, S, D), jnp.float32)
    textual = jax.random.normal(k_txt, (B, S, D), jnp.float32)
    params = init_params(k_par, D, DK, DV, H, DFF)

    out = refine_textual_layer(visual, textual, params, h=H, d_k=DK, d_v=DV)
    out = jax.block_until_ready(out)
    assert out.shape == (B, S, D) and out.dtype == jnp.float32
    assert bool(jnp.all(jnp.isfinite(out)))
    print("KERNEL_OK")
</pallas_src>

<mosaic_0001>
module attributes {stable_mosaic.version = 11 : i64} {
  func.func @refine_textual_kernel(%arg0: i32, %arg1: i32, %arg2: memref<1x8x32xf32, #tpu.memory_space<vmem>>, %arg3: memref<1x8x32xf32, #tpu.memory_space<vmem>>, %arg4: memref<1x8x32xf32, #tpu.memory_space<vmem>>, %arg5: memref<4x32x8xbf16, #tpu.memory_space<vmem>>, %arg6: memref<4x1x8xf32, #tpu.memory_space<vmem>>, %arg7: memref<4x32x8xbf16, #tpu.memory_space<vmem>>, %arg8: memref<4x1x8xf32, #tpu.memory_space<vmem>>, %arg9: memref<4x32x8xbf16, #tpu.memory_space<vmem>>, %arg10: memref<4x1x8xf32, #tpu.memory_space<vmem>>, %arg11: memref<4x8x32xbf16, #tpu.memory_space<vmem>>, %arg12: memref<1x32xf32, #tpu.memory_space<vmem>>, %arg13: memref<1x32xf32, #tpu.memory_space<vmem>>, %arg14: memref<1x32xf32, #tpu.memory_space<vmem>>, %arg15: memref<1x32xf32, #tpu.memory_space<vmem>>, %arg16: memref<1x32xf32, #tpu.memory_space<vmem>>, %arg17: memref<32x64xbf16, #tpu.memory_space<vmem>>, %arg18: memref<1x64xf32, #tpu.memory_space<vmem>>, %arg19: memref<64x32xbf16, #tpu.memory_space<vmem>>, %arg20: memref<1x32xf32, #tpu.memory_space<vmem>>, %arg21: memref<1x32xf32, #tpu.memory_space<vmem>>, %arg22: memref<1x32xf32, #tpu.memory_space<vmem>>, %arg23: memref<1x8x32xf32, #tpu.memory_space<vmem>>) attributes {dimension_semantics = [#tpu.dimension_semantics<parallel>, #tpu.dimension_semantics<parallel>], iteration_bounds = array<i64: 2, 1>, scalar_prefetch = 0 : i64, scratch_operands = 0 : i64, tpu.core_type = #tpu.core_type<tc>, window_params = [{transform_indices = @transform_0, window_bounds = array<i64: 1, 8, 32>}, {transform_indices = @transform_1, window_bounds = array<i64: 1, 8, 32>}, {transform_indices = @transform_2, window_bounds = array<i64: 1, 8, 32>}, {pipeline_mode = #tpu.pipeline_mode<synchronous>, transform_indices = @transform_3, window_bounds = array<i64: 4, 32, 8>}, {pipeline_mode = #tpu.pipeline_mode<synchronous>, transform_indices = @transform_4, window_bounds = array<i64: 4, 1, 8>}, {pipeline_mode = #tpu.pipeline_mode<synchronous>, transform_indices = @transform_5, window_bounds = array<i64: 4, 32, 8>}, {pipeline_mode = #tpu.pipeline_mode<synchronous>, transform_indices = @transform_6, window_bounds = array<i64: 4, 1, 8>}, {pipeline_mode = #tpu.pipeline_mode<synchronous>, transform_indices = @transform_7, window_bounds = array<i64: 4, 32, 8>}, {pipeline_mode = #tpu.pipeline_mode<synchronous>, transform_indices = @transform_8, window_bounds = array<i64: 4, 1, 8>}, {pipeline_mode = #tpu.pipeline_mode<synchronous>, transform_indices = @transform_9, window_bounds = array<i64: 4, 8, 32>}, {pipeline_mode = #tpu.pipeline_mode<synchronous>, transform_indices = @transform_10, window_bounds = array<i64: 1, 32>}, {pipeline_mode = #tpu.pipeline_mode<synchronous>, transform_indices = @transform_11, window_bounds = array<i64: 1, 32>}, {pipeline_mode = #tpu.pipeline_mode<synchronous>, transform_indices = @transform_12, window_bounds = array<i64: 1, 32>}, {pipeline_mode = #tpu.pipeline_mode<synchronous>, transform_indices = @transform_13, window_bounds = array<i64: 1, 32>}, {pipeline_mode = #tpu.pipeline_mode<synchronous>, transform_indices = @transform_14, window_bounds = array<i64: 1, 32>}, {pipeline_mode = #tpu.pipeline_mode<synchronous>, transform_indices = @transform_15, window_bounds = array<i64: 32, 64>}, {pipeline_mode = #tpu.pipeline_mode<synchronous>, transform_indices = @transform_16, window_bounds = array<i64: 1, 64>}, {pipeline_mode = #tpu.pipeline_mode<synchronous>, transform_indices = @transform_17, window_bounds = array<i64: 64, 32>}, {pipeline_mode = #tpu.pipeline_mode<synchronous>, transform_indices = @transform_18, window_bounds = array<i64: 1, 32>}, {pipeline_mode = #tpu.pipeline_mode<synchronous>, transform_indices = @transform_19, window_bounds = array<i64: 1, 32>}, {pipeline_mode = #tpu.pipeline_mode<synchronous>, transform_indices = @transform_20, window_bounds = array<i64: 1, 32>}, {transform_indices = @transform_21, window_bounds = array<i64: 1, 8, 32>}]} {
    %c0 = arith.constant 0 : index
    %c0_0 = arith.constant 0 : index
    %c0_1 = arith.constant 0 : index
    %0 = vector.load %arg2[%c0, %c0_0, %c0_1] : memref<1x8x32xf32, #tpu.memory_space<vmem>>, vector<1x8x32xf32>
    %1 = vector.shape_cast %0 : vector<1x8x32xf32> to vector<8x32xf32>
    %c0_2 = arith.constant 0 : index
    %c0_3 = arith.constant 0 : index
    %c0_4 = arith.constant 0 : index
    %2 = vector.load %arg3[%c0_2, %c0_3, %c0_4] : memref<1x8x32xf32, #tpu.memory_space<vmem>>, vector<1x8x32xf32>
    %3 = vector.shape_cast %2 : vector<1x8x32xf32> to vector<8x32xf32>
    %c0_5 = arith.constant 0 : index
    %c0_6 = arith.constant 0 : index
    %c0_7 = arith.constant 0 : index
    %4 = vector.load %arg4[%c0_5, %c0_6, %c0_7] : memref<1x8x32xf32, #tpu.memory_space<vmem>>, vector<1x8x32xf32>
    %5 = vector.shape_cast %4 : vector<1x8x32xf32> to vector<8x32xf32>
    %6 = arith.truncf %1 : vector<8x32xf32> to vector<8x32xbf16>
    %7 = vector.shape_cast %6 : vector<8x32xbf16> to vector<1x8x32xbf16>
    %8 = vector.shape_cast %7 : vector<1x8x32xbf16> to vector<1x8x32xbf16>
    %9 = vector.broadcast %8 : vector<1x8x32xbf16> to vector<4x8x32xbf16>
    %10 = arith.truncf %3 : vector<8x32xf32> to vector<8x32xbf16>
    %11 = vector.shape_cast %10 : vector<8x32xbf16> to vector<1x8x32xbf16>
    %12 = vector.shape_cast %11 : vector<1x8x32xbf16> to vector<1x8x32xbf16>
    %13 = vector.broadcast %12 : vector<1x8x32xbf16> to vector<4x8x32xbf16>
    %c0_8 = arith.constant 0 : index
    %c0_9 = arith.constant 0 : index
    %c0_10 = arith.constant 0 : index
    %14 = vector.load %arg5[%c0_8, %c0_9, %c0_10] : memref<4x32x8xbf16, #tpu.memory_space<vmem>>, vector<4x32x8xbf16>
    %cst = arith.constant dense<0.000000e+00> : vector<4x8x8xf32>
    %15 = tpu.matmul %9, %14, %cst {dimension_numbers = #tpu.dot_dimension_numbers<[2], [1], [1], [2], [0, 0, 0, 1, 1, 2], [0], [0]>} : vector<4x8x32xbf16>, vector<4x32x8xbf16>, vector<4x8x8xf32> -> vector<4x8x8xf32>
    %c0_11 = arith.constant 0 : index
    %c0_12 = arith.constant 0 : index
    %c0_13 = arith.constant 0 : index
    %16 = vector.load %arg6[%c0_11, %c0_12, %c0_13] : memref<4x1x8xf32, #tpu.memory_space<vmem>>, vector<4x1x8xf32>
    %17 = vector.broadcast %16 : vector<4x1x8xf32> to vector<4x8x8xf32>
    %18 = arith.addf %15, %17 : vector<4x8x8xf32>
    %c0_14 = arith.constant 0 : index
    %c0_15 = arith.constant 0 : index
    %c0_16 = arith.constant 0 : index
    %19 = vector.load %arg7[%c0_14, %c0_15, %c0_16] : memref<4x32x8xbf16, #tpu.memory_space<vmem>>, vector<4x32x8xbf16>
    %cst_17 = arith.constant dense<0.000000e+00> : vector<4x8x8xf32>
    %20 = tpu.matmul %13, %19, %cst_17 {dimension_numbers = #tpu.dot_dimension_numbers<[2], [1], [1], [2], [0, 0, 0, 1, 1, 2], [0], [0]>} : vector<4x8x32xbf16>, vector<4x32x8xbf16>, vector<4x8x8xf32> -> vector<4x8x8xf32>
    %c0_18 = arith.constant 0 : index
    %c0_19 = arith.constant 0 : index
    %c0_20 = arith.constant 0 : index
    %21 = vector.load %arg8[%c0_18, %c0_19, %c0_20] : memref<4x1x8xf32, #tpu.memory_space<vmem>>, vector<4x1x8xf32>
    %22 = vector.broadcast %21 : vector<4x1x8xf32> to vector<4x8x8xf32>
    %23 = arith.addf %20, %22 : vector<4x8x8xf32>
    %c0_21 = arith.constant 0 : index
    %c0_22 = arith.constant 0 : index
    %c0_23 = arith.constant 0 : index
    %24 = vector.load %arg9[%c0_21, %c0_22, %c0_23] : memref<4x32x8xbf16, #tpu.memory_space<vmem>>, vector<4x32x8xbf16>
    %cst_24 = arith.constant dense<0.000000e+00> : vector<4x8x8xf32>
    %25 = tpu.matmul %13, %24, %cst_24 {dimension_numbers = #tpu.dot_dimension_numbers<[2], [1], [1], [2], [0, 0, 0, 1, 1, 2], [0], [0]>} : vector<4x8x32xbf16>, vector<4x32x8xbf16>, vector<4x8x8xf32> -> vector<4x8x8xf32>
    %c0_25 = arith.constant 0 : index
    %c0_26 = arith.constant 0 : index
    %c0_27 = arith.constant 0 : index
    %26 = vector.load %arg10[%c0_25, %c0_26, %c0_27] : memref<4x1x8xf32, #tpu.memory_space<vmem>>, vector<4x1x8xf32>
    %27 = vector.broadcast %26 : vector<4x1x8xf32> to vector<4x8x8xf32>
    %28 = arith.addf %25, %27 : vector<4x8x8xf32>
    %29 = arith.truncf %18 : vector<4x8x8xf32> to vector<4x8x8xbf16>
    %30 = arith.truncf %23 : vector<4x8x8xf32> to vector<4x8x8xbf16>
    %cst_28 = arith.constant dense<0.000000e+00> : vector<4x8x8xf32>
    %31 = tpu.matmul %29, %30, %cst_28 {dimension_numbers = #tpu.dot_dimension_numbers<[2], [2], [1], [1], [0, 0, 0, 1, 1, 1], [0], [0]>} : vector<4x8x8xbf16>, vector<4x8x8xbf16>, vector<4x8x8xf32> -> vector<4x8x8xf32>
    %cst_29 = arith.constant dense<0xFF800000> : vector<4x8xf32>
    %32 = vector.multi_reduction <maximumf>, %31, %cst_29 [2] : vector<4x8x8xf32> to vector<4x8xf32>
    %33 = vector.shape_cast %32 : vector<4x8xf32> to vector<4x8x1xf32>
    %34 = vector.broadcast %33 : vector<4x8x1xf32> to vector<4x8x8xf32>
    %35 = arith.subf %31, %34 : vector<4x8x8xf32>
    %36 = math.exp %35 : vector<4x8x8xf32>
    %cst_30 = arith.constant dense<0.000000e+00> : vector<4x8xf32>
    %37 = vector.multi_reduction <add>, %36, %cst_30 [2] : vector<4x8x8xf32> to vector<4x8xf32>
    %38 = vector.shape_cast %37 : vector<4x8xf32> to vector<4x8x1xf32>
    %39 = tpu.reciprocal %38 {approx = true} : vector<4x8x1xf32> -> vector<4x8x1xf32>
    %40 = vector.broadcast %39 : vector<4x8x1xf32> to vector<4x8x8xf32>
    %41 = arith.mulf %36, %40 : vector<4x8x8xf32>
    %42 = arith.truncf %41 : vector<4x8x8xf32> to vector<4x8x8xbf16>
    %43 = arith.truncf %28 : vector<4x8x8xf32> to vector<4x8x8xbf16>
    %cst_31 = arith.constant dense<0.000000e+00> : vector<4x8x8xf32>
    %44 = tpu.matmul %42, %43, %cst_31 {dimension_numbers = #tpu.dot_dimension_numbers<[2], [1], [1], [2], [0, 0, 0, 1, 1, 2], [0], [0]>} : vector<4x8x8xbf16>, vector<4x8x8xbf16>, vector<4x8x8xf32> -> vector<4x8x8xf32>
    %45 = arith.truncf %44 : vector<4x8x8xf32> to vector<4x8x8xbf16>
    %c0_32 = arith.constant 0 : index
    %c0_33 = arith.constant 0 : index
    %c0_34 = arith.constant 0 : index
    %46 = vector.load %arg11[%c0_32, %c0_33, %c0_34] : memref<4x8x32xbf16, #tpu.memory_space<vmem>>, vector<4x8x32xbf16>
    %cst_35 = arith.constant dense<0.000000e+00> : vector<4x8x32xf32>
    %47 = tpu.matmul %45, %46, %cst_35 {dimension_numbers = #tpu.dot_dimension_numbers<[2], [1], [1], [2], [0, 0, 0, 1, 1, 2], [0], [0]>} : vector<4x8x8xbf16>, vector<4x8x32xbf16>, vector<4x8x32xf32> -> vector<4x8x32xf32>
    %cst_36 = arith.constant dense<0.000000e+00> : vector<8x32xf32>
    %48 = vector.multi_reduction <add>, %47, %cst_36 [0] : vector<4x8x32xf32> to vector<8x32xf32>
    %c0_37 = arith.constant 0 : index
    %c0_38 = arith.constant 0 : index
    %49 = vector.load %arg12[%c0_37, %c0_38] : memref<1x32xf32, #tpu.memory_space<vmem>>, vector<1x32xf32>
    %50 = vector.broadcast %49 : vector<1x32xf32> to vector<8x32xf32>
    %51 = arith.addf %48, %50 : vector<8x32xf32>
    %52 = arith.addf %1, %51 : vector<8x32xf32>
    %c0_39 = arith.constant 0 : index
    %c0_40 = arith.constant 0 : index
    %53 = vector.load %arg13[%c0_39, %c0_40] : memref<1x32xf32, #tpu.memory_space<vmem>>, vector<1x32xf32>
    %c0_41 = arith.constant 0 : index
    %c0_42 = arith.constant 0 : index
    %54 = vector.load %arg14[%c0_41, %c0_42] : memref<1x32xf32, #tpu.memory_space<vmem>>, vector<1x32xf32>
    %cst_43 = arith.constant dense<0.000000e+00> : vector<8xf32>
    %55 = vector.multi_reduction <add>, %52, %cst_43 [1] : vector<8x32xf32> to vector<8xf32>
    %56 = vector.shape_cast %55 : vector<8xf32> to vector<8x1xf32>
    %cst_44 = arith.constant 3.200000e+01 : f32
    %57 = vector.broadcast %cst_44 : f32 to vector<8x1xf32>
    %58 = arith.divf %56, %57 : vector<8x1xf32>
    %59 = vector.broadcast %58 : vector<8x1xf32> to vector<8x32xf32>
    %60 = arith.subf %52, %59 : vector<8x32xf32>
    %61 = arith.mulf %60, %60 : vector<8x32xf32>
    %cst_45 = arith.constant dense<0.000000e+00> : vector<8xf32>
    %62 = vector.multi_reduction <add>, %61, %cst_45 [1] : vector<8x32xf32> to vector<8xf32>
    %63 = vector.shape_cast %62 : vector<8xf32> to vector<8x1xf32>
    %cst_46 = arith.constant 3.200000e+01 : f32
    %64 = vector.broadcast %cst_46 : f32 to vector<8x1xf32>
    %65 = arith.divf %63, %64 : vector<8x1xf32>
    %66 = vector.broadcast %58 : vector<8x1xf32> to vector<8x32xf32>
    %67 = arith.subf %52, %66 : vector<8x32xf32>
    %cst_47 = arith.constant 9.99999974E-6 : f32
    %68 = vector.broadcast %cst_47 : f32 to vector<8x1xf32>
    %69 = arith.addf %65, %68 : vector<8x1xf32>
    %70 = math.rsqrt %69 : vector<8x1xf32>
    %71 = vector.broadcast %70 : vector<8x1xf32> to vector<8x32xf32>
    %72 = arith.mulf %67, %71 : vector<8x32xf32>
    %73 = vector.broadcast %53 : vector<1x32xf32> to vector<8x32xf32>
    %74 = arith.mulf %72, %73 : vector<8x32xf32>
    %75 = vector.broadcast %54 : vector<1x32xf32> to vector<8x32xf32>
    %76 = arith.addf %74, %75 : vector<8x32xf32>
    %77 = arith.addf %76, %5 : vector<8x32xf32>
    %c0_48 = arith.constant 0 : index
    %c0_49 = arith.constant 0 : index
    %78 = vector.load %arg15[%c0_48, %c0_49] : memref<1x32xf32, #tpu.memory_space<vmem>>, vector<1x32xf32>
    %c0_50 = arith.constant 0 : index
    %c0_51 = arith.constant 0 : index
    %79 = vector.load %arg16[%c0_50, %c0_51] : memref<1x32xf32, #tpu.memory_space<vmem>>, vector<1x32xf32>
    %cst_52 = arith.constant dense<0.000000e+00> : vector<8xf32>
    %80 = vector.multi_reduction <add>, %77, %cst_52 [1] : vector<8x32xf32> to vector<8xf32>
    %81 = vector.shape_cast %80 : vector<8xf32> to vector<8x1xf32>
    %cst_53 = arith.constant 3.200000e+01 : f32
    %82 = vector.broadcast %cst_53 : f32 to vector<8x1xf32>
    %83 = arith.divf %81, %82 : vector<8x1xf32>
    %84 = vector.broadcast %83 : vector<8x1xf32> to vector<8x32xf32>
    %85 = arith.subf %77, %84 : vector<8x32xf32>
    %86 = arith.mulf %85, %85 : vector<8x32xf32>
    %cst_54 = arith.constant dense<0.000000e+00> : vector<8xf32>
    %87 = vector.multi_reduction <add>, %86, %cst_54 [1] : vector<8x32xf32> to vector<8xf32>
    %88 = vector.shape_cast %87 : vector<8xf32> to vector<8x1xf32>
    %cst_55 = arith.constant 3.200000e+01 : f32
    %89 = vector.broadcast %cst_55 : f32 to vector<8x1xf32>
    %90 = arith.divf %88, %89 : vector<8x1xf32>
    %91 = vector.broadcast %83 : vector<8x1xf32> to vector<8x32xf32>
    %92 = arith.subf %77, %91 : vector<8x32xf32>
    %cst_56 = arith.constant 9.99999974E-6 : f32
    %93 = vector.broadcast %cst_56 : f32 to vector<8x1xf32>
    %94 = arith.addf %90, %93 : vector<8x1xf32>
    %95 = math.rsqrt %94 : vector<8x1xf32>
    %96 = vector.broadcast %95 : vector<8x1xf32> to vector<8x32xf32>
    %97 = arith.mulf %92, %96 : vector<8x32xf32>
    %98 = vector.broadcast %78 : vector<1x32xf32> to vector<8x32xf32>
    %99 = arith.mulf %97, %98 : vector<8x32xf32>
    %100 = vector.broadcast %79 : vector<1x32xf32> to vector<8x32xf32>
    %101 = arith.addf %99, %100 : vector<8x32xf32>
    %102 = arith.truncf %101 : vector<8x32xf32> to vector<8x32xbf16>
    %c0_57 = arith.constant 0 : index
    %c0_58 = arith.constant 0 : index
    %103 = vector.load %arg17[%c0_57, %c0_58] : memref<32x64xbf16, #tpu.memory_space<vmem>>, vector<32x64xbf16>
    %cst_59 = arith.constant dense<0.000000e+00> : vector<8x64xf32>
    %104 = tpu.matmul %102, %103, %cst_59 {dimension_numbers = #tpu.dot_dimension_numbers<[1], [0], [0], [1], [0, 0, 1, 1], [], []>} : vector<8x32xbf16>, vector<32x64xbf16>, vector<8x64xf32> -> vector<8x64xf32>
    %c0_60 = arith.constant 0 : index
    %c0_61 = arith.constant 0 : index
    %105 = vector.load %arg18[%c0_60, %c0_61] : memref<1x64xf32, #tpu.memory_space<vmem>>, vector<1x64xf32>
    %106 = vector.broadcast %105 : vector<1x64xf32> to vector<8x64xf32>
    %107 = arith.addf %104, %106 : vector<8x64xf32>
    %cst_62 = arith.constant 0.000000e+00 : f32
    %108 = vector.broadcast %cst_62 : f32 to vector<8x64xf32>
    %109 = arith.maximumf %107, %108 : vector<8x64xf32>
    %110 = arith.truncf %109 : vector<8x64xf32> to vector<8x64xbf16>
    %c0_63 = arith.constant 0 : index
    %c0_64 = arith.constant 0 : index
    %111 = vector.load %arg19[%c0_63, %c0_64] : memref<64x32xbf16, #tpu.memory_space<vmem>>, vector<64x32xbf16>
    %cst_65 = arith.constant dense<0.000000e+00> : vector<8x32xf32>
    %112 = tpu.matmul %110, %111, %cst_65 {dimension_numbers = #tpu.dot_dimension_numbers<[1], [0], [0], [1], [0, 0, 1, 1], [], []>} : vector<8x64xbf16>, vector<64x32xbf16>, vector<8x32xf32> -> vector<8x32xf32>
    %c0_66 = arith.constant 0 : index
    %c0_67 = arith.constant 0 : index
    %113 = vector.load %arg20[%c0_66, %c0_67] : memref<1x32xf32, #tpu.memory_space<vmem>>, vector<1x32xf32>
    %114 = vector.broadcast %113 : vector<1x32xf32> to vector<8x32xf32>
    %115 = arith.addf %112, %114 : vector<8x32xf32>
    %116 = arith.addf %101, %115 : vector<8x32xf32>
    %c0_68 = arith.constant 0 : index
    %c0_69 = arith.constant 0 : index
    %117 = vector.load %arg21[%c0_68, %c0_69] : memref<1x32xf32, #tpu.memory_space<vmem>>, vector<1x32xf32>
    %c0_70 = arith.constant 0 : index
    %c0_71 = arith.constant 0 : index
    %118 = vector.load %arg22[%c0_70, %c0_71] : memref<1x32xf32, #tpu.memory_space<vmem>>, vector<1x32xf32>
    %cst_72 = arith.constant dense<0.000000e+00> : vector<8xf32>
    %119 = vector.multi_reduction <add>, %116, %cst_72 [1] : vector<8x32xf32> to vector<8xf32>
    %120 = vector.shape_cast %119 : vector<8xf32> to vector<8x1xf32>
    %cst_73 = arith.constant 3.200000e+01 : f32
    %121 = vector.broadcast %cst_73 : f32 to vector<8x1xf32>
    %122 = arith.divf %120, %121 : vector<8x1xf32>
    %123 = vector.broadcast %122 : vector<8x1xf32> to vector<8x32xf32>
    %124 = arith.subf %116, %123 : vector<8x32xf32>
    %125 = arith.mulf %124, %124 : vector<8x32xf32>
    %cst_74 = arith.constant dense<0.000000e+00> : vector<8xf32>
    %126 = vector.multi_reduction <add>, %125, %cst_74 [1] : vector<8x32xf32> to vector<8xf32>
    %127 = vector.shape_cast %126 : vector<8xf32> to vector<8x1xf32>
    %cst_75 = arith.constant 3.200000e+01 : f32
    %128 = vector.broadcast %cst_75 : f32 to vector<8x1xf32>
    %129 = arith.divf %127, %128 : vector<8x1xf32>
    %130 = vector.broadcast %122 : vector<8x1xf32> to vector<8x32xf32>
    %131 = arith.subf %116, %130 : vector<8x32xf32>
    %cst_76 = arith.constant 9.99999974E-6 : f32
    %132 = vector.broadcast %cst_76 : f32 to vector<8x1xf32>
    %133 = arith.addf %129, %132 : vector<8x1xf32>
    %134 = math.rsqrt %133 : vector<8x1xf32>
    %135 = vector.broadcast %134 : vector<8x1xf32> to vector<8x32xf32>
    %136 = arith.mulf %131, %135 : vector<8x32xf32>
    %137 = vector.broadcast %117 : vector<1x32xf32> to vector<8x32xf32>
    %138 = arith.mulf %136, %137 : vector<8x32xf32>
    %139 = vector.broadcast %118 : vector<1x32xf32> to vector<8x32xf32>
    %140 = arith.addf %138, %139 : vector<8x32xf32>
    %c0_77 = arith.constant 0 : index
    %c0_78 = arith.constant 0 : index
    %c0_79 = arith.constant 0 : index
    %141 = vector.load %arg23[%c0_77, %c0_78, %c0_79] : memref<1x8x32xf32, #tpu.memory_space<vmem>>, vector<1x8x32xf32>
    %142 = vector.shape_cast %141 : vector<1x8x32xf32> to vector<8x32xf32>
    %143 = vector.shape_cast %140 : vector<8x32xf32> to vector<1x8x32xf32>
    tpu.vector_store %arg23[%c0_77, %c0_78, %c0_79], %143 {strides = array<i32>} : memref<1x8x32xf32, #tpu.memory_space<vmem>>, vector<1x8x32xf32>,
    return
  }
  func.func @transform_0(%arg0: i32, %arg1: i32) -> (i32, i32, i32) {
    %c0_i32 = arith.constant 0 : i32
    %c0_i32_0 = arith.constant 0 : i32
    return %arg0, %arg1, %c0_i32 : i32, i32, i32
  }
  func.func @transform_1(%arg0: i32, %arg1: i32) -> (i32, i32, i32) {
    %c0_i32 = arith.constant 0 : i32
    %c0_i32_0 = arith.constant 0 : i32
    %c0_i32_1 = arith.constant 0 : i32
    return %arg0, %c0_i32, %c0_i32_0 : i32, i32, i32
  }
  func.func @transform_2(%arg0: i32, %arg1: i32) -> (i32, i32, i32) {
    %c0_i32 = arith.constant 0 : i32
    %c0_i32_0 = arith.constant 0 : i32
    return %arg0, %arg1, %c0_i32 : i32, i32, i32
  }
  func.func @transform_3(%arg0: i32, %arg1: i32) -> (i32, i32, i32) {
    %c0_i32 = arith.constant 0 : i32
    %c0_i32_0 = arith.constant 0 : i32
    %c0_i32_1 = arith.constant 0 : i32
    %c0_i32_2 = arith.constant 0 : i32
    return %c0_i32, %c0_i32_0, %c0_i32_1 : i32, i32, i32
  }
  func.func @transform_4(%arg0: i32, %arg1: i32) -> (i32, i32, i32) {
    %c0_i32 = arith.constant 0 : i32
    %c0_i32_0 = arith.constant 0 : i32
    %c0_i32_1 = arith.constant 0 : i32
    %c0_i32_2 = arith.constant 0 : i32
    return %c0_i32, %c0_i32_0, %c0_i32_1 : i32, i32, i32
  }
  func.func @transform_5(%arg0: i32, %arg1: i32) -> (i32, i32, i32) {
    %c0_i32 = arith.constant 0 : i32
    %c0_i32_0 = arith.constant 0 : i32
    %c0_i32_1 = arith.constant 0 : i32
    %c0_i32_2 = arith.constant 0 : i32
    return %c0_i32, %c0_i32_0, %c0_i32_1 : i32, i32, i32
  }
  func.func @transform_6(%arg0: i32, %arg1: i32) -> (i32, i32, i32) {
    %c0_i32 = arith.constant 0 : i32
    %c0_i32_0 = arith.constant 0 : i32
    %c0_i32_1 = arith.constant 0 : i32
    %c0_i32_2 = arith.constant 0 : i32
    return %c0_i32, %c0_i32_0, %c0_i32_1 : i32, i32, i32
  }
  func.func @transform_7(%arg0: i32, %arg1: i32) -> (i32, i32, i32) {
    %c0_i32 = arith.constant 0 : i32
    %c0_i32_0 = arith.constant 0 : i32
    %c0_i32_1 = arith.constant 0 : i32
    %c0_i32_2 = arith.constant 0 : i32
    return %c0_i32, %c0_i32_0, %c0_i32_1 : i32, i32, i32
  }
  func.func @transform_8(%arg0: i32, %arg1: i32) -> (i32, i32, i32) {
    %c0_i32 = arith.constant 0 : i32
    %c0_i32_0 = arith.constant 0 : i32
    %c0_i32_1 = arith.constant 0 : i32
    %c0_i32_2 = arith.constant 0 : i32
    return %c0_i32, %c0_i32_0, %c0_i32_1 : i32, i32, i32
  }
  func.func @transform_9(%arg0: i32, %arg1: i32) -> (i32, i32, i32) {
    %c0_i32 = arith.constant 0 : i32
    %c0_i32_0 = arith.constant 0 : i32
    %c0_i32_1 = arith.constant 0 : i32
    %c0_i32_2 = arith.constant 0 : i32
    return %c0_i32, %c0_i32_0, %c0_i32_1 : i32, i32, i32
  }
  func.func @transform_10(%arg0: i32, %arg1: i32) -> (i32, i32) {
    %c0_i32 = arith.constant 0 : i32
    %c0_i32_0 = arith.constant 0 : i32
    %c0_i32_1 = arith.constant 0 : i32
    return %c0_i32, %c0_i32_0 : i32, i32
  }
  func.func @transform_11(%arg0: i32, %arg1: i32) -> (i32, i32) {
    %c0_i32 = arith.constant 0 : i32
    %c0_i32_0 = arith.constant 0 : i32
    %c0_i32_1 = arith.constant 0 : i32
    return %c0_i32, %c0_i32_0 : i32, i32
  }
  func.func @transform_12(%arg0: i32, %arg1: i32) -> (i32, i32) {
    %c0_i32 = arith.constant 0 : i32
    %c0_i32_0 = arith.constant 0 : i32
    %c0_i32_1 = arith.constant 0 : i32
    return %c0_i32, %c0_i32_0 : i32, i32
  }
  func.func @transform_13(%arg0: i32, %arg1: i32) -> (i32, i32) {
    %c0_i32 = arith.constant 0 : i32
    %c0_i32_0 = arith.constant 0 : i32
    %c0_i32_1 = arith.constant 0 : i32
    return %c0_i32, %c0_i32_0 : i32, i32
  }
  func.func @transform_14(%arg0: i32, %arg1: i32) -> (i32, i32) {
    %c0_i32 = arith.constant 0 : i32
    %c0_i32_0 = arith.constant 0 : i32
    %c0_i32_1 = arith.constant 0 : i32
    return %c0_i32, %c0_i32_0 : i32, i32
  }
  func.func @transform_15(%arg0: i32, %arg1: i32) -> (i32, i32) {
    %c0_i32 = arith.constant 0 : i32
    %c0_i32_0 = arith.constant 0 : i32
    %c0_i32_1 = arith.constant 0 : i32
    return %c0_i32, %c0_i32_0 : i32, i32
  }
  func.func @transform_16(%arg0: i32, %arg1: i32) -> (i32, i32) {
    %c0_i32 = arith.constant 0 : i32
    %c0_i32_0 = arith.constant 0 : i32
    %c0_i32_1 = arith.constant 0 : i32
    return %c0_i32, %c0_i32_0 : i32, i32
  }
  func.func @transform_17(%arg0: i32, %arg1: i32) -> (i32, i32) {
    %c0_i32 = arith.constant 0 : i32
    %c0_i32_0 = arith.constant 0 : i32
    %c0_i32_1 = arith.constant 0 : i32
    return %c0_i32, %c0_i32_0 : i32, i32
  }
  func.func @transform_18(%arg0: i32, %arg1: i32) -> (i32, i32) {
    %c0_i32 = arith.constant 0 : i32
    %c0_i32_0 = arith.constant 0 : i32
    %c0_i32_1 = arith.constant 0 : i32
    return %c0_i32, %c0_i32_0 : i32, i32
  }
  func.func @transform_19(%arg0: i32, %arg1: i32) -> (i32, i32) {
    %c0_i32 = arith.constant 0 : i32
    %c0_i32_0 = arith.constant 0 : i32
    %c0_i32_1 = arith.constant 0 : i32
    return %c0_i32, %c0_i32_0 : i32, i32
  }
  func.func @transform_20(%arg0: i32, %arg1: i32) -> (i32, i32) {
    %c0_i32 = arith.constant 0 : i32
    %c0_i32_0 = arith.constant 0 : i32
    %c0_i32_1 = arith.constant 0 : i32
    return %c0_i32, %c0_i32_0 : i32, i32
  }
  func.func @transform_21(%arg0: i32, %arg1: i32) -> (i32, i32, i32) {
    %c0_i32 = arith.constant 0 : i32
    %c0_i32_0 = arith.constant 0 : i32
    return %arg0, %arg1, %c0_i32 : i32, i32, i32
  }
}

</mosaic_0001>

<bundles_post_ra>
// kernel: tpu_custom_call.1
= control target key start
LH: loop header
LB: loop body
LE: loop exit
PB: predicated region body
PF: predicated region fallthrough
CT: control target
= control target key end

     0   :  { %s5371_s0 = inlined_call_operand.hbm [shape: f32[2,8,32], index: 0, kind: input, shape index: {}]   ;;  %s5372_s1 = inlined_call_operand.hbm [shape: f32[2,8,32], index: 1, kind: input, shape index: {}]   ;;  %s5373_s2 = inlined_call_operand.hbm [shape: f32[2,8,32], index: 2, kind: input, shape index: {}]   ;;  %s5374_s3 = inlined_call_operand.hbm [shape: bf16[4,32,8], index: 3, kind: input, shape index: {}]   ;;  %s5375_s4 = inlined_call_operand.hbm [shape: f32[4,1,8], index: 4, kind: input, shape index: {}]   ;;  %s5376_s5 = inlined_call_operand.hbm [shape: bf16[4,32,8], index: 5, kind: input, shape index: {}]   ;;  %s5377_s6 = inlined_call_operand.hbm [shape: f32[4,1,8], index: 6, kind: input, shape index: {}]   ;;  %s5378_s7 = inlined_call_operand.hbm [shape: bf16[4,32,8], index: 7, kind: input, shape index: {}]   ;;  %s5379_s8 = inlined_call_operand.hbm [shape: f32[4,1,8], index: 8, kind: input, shape index: {}]   ;;  %s5380_s9 = inlined_call_operand.hbm [shape: bf16[4,8,32], index: 9, kind: input, shape index: {}]   ;;  %s5381_s10 = inlined_call_operand.hbm [shape: f32[1,32], index: 10, kind: input, shape index: {}]   ;;  %s5382_s11 = inlined_call_operand.hbm [shape: f32[1,32], index: 11, kind: input, shape index: {}]   ;;  %s5383_s12 = inlined_call_operand.hbm [shape: f32[1,32], index: 12, kind: input, shape index: {}]   ;;  %s5384_s13 = inlined_call_operand.hbm [shape: f32[1,32], index: 13, kind: input, shape index: {}]   ;;  %s5385_s14 = inlined_call_operand.hbm [shape: f32[1,32], index: 14, kind: input, shape index: {}]   ;;  %s5386_s15 = inlined_call_operand.hbm [shape: bf16[32,64], index: 15, kind: input, shape index: {}]   ;;  %s5387_s16 = inlined_call_operand.hbm [shape: f32[1,64], index: 16, kind: input, shape index: {}]   ;;  %s5388_s17 = inlined_call_operand.hbm [shape: bf16[64,32], index: 17, kind: input, shape index: {}]   ;;  %s5389_s18 = inlined_call_operand.hbm [shape: f32[1,32], index: 18, kind: input, shape index: {}]   ;;  %s5390_s19 = inlined_call_operand.hbm [shape: f32[1,32], index: 19, kind: input, shape index: {}]   ;;  %s5391_s20 = inlined_call_operand.hbm [shape: f32[1,32], index: 20, kind: input, shape index: {}]   ;;  %s5392_s21 = inlined_call_operand.hbm [shape: f32[2,8,32], index: 21, kind: output, shape index: {}]  }
   0x1   :  { %5434 = sst [smem:[#allocation55_spill]] %s5371_s0 }
   0x2   :  { %5435 = sst [smem:[#allocation56_spill]] %s5372_s1 }
   0x3   :  { %5436 = sst [smem:[#allocation57_spill]] %s5373_s2 }
   0x4   :  { %5437 = sst [smem:[#allocation58_spill]] %s5374_s3 }
   0x5   :  { %5438 = sst [smem:[#allocation59_spill]] %s5375_s4 }
   0x6   :  { %5439 = sst [smem:[#allocation60_spill]] %s5376_s5 }
   0x7   :  { %5440 = sst [smem:[#allocation61_spill]] %s5377_s6 }
   0x8   :  { %5441 = sst [smem:[#allocation62_spill]] %s5378_s7 }
   0x9   :  { %5442 = sst [smem:[#allocation63_spill]] %s5379_s8 }
   0xa   :  { %5443 = sst [smem:[#allocation64_spill]] %s5380_s9 }
   0xb   :  { %5444 = sst [smem:[#allocation65_spill]] %s5381_s10 }
   0xc   :  { %5445 = sst [smem:[#allocation66_spill]] %s5382_s11 }
   0xd   :  { %5446 = sst [smem:[#allocation67_spill]] %s5383_s12 }
   0xe   :  { %5447 = sst [smem:[#allocation68_spill]] %s5384_s13 }
   0xf   :  { %5448 = sst [smem:[#allocation69_spill]] %s5385_s14 }
  0x10   :  { %5449 = sst [smem:[#allocation70_spill]] %s5386_s15 }
  0x11   :  { %5450 = sst [smem:[#allocation71_spill]] %s5387_s16 }
  0x12   :  { %5451 = sst [smem:[#allocation72_spill]] %s5388_s17 }
  0x13   :  { %5452 = sst [smem:[#allocation73_spill]] %s5389_s18 }
  0x14   :  { %5453 = sst [smem:[#allocation74_spill]] %s5390_s19 }
  0x15   :  { %5454 = sst [smem:[#allocation75_spill]] %s5391_s20 }
  0x16   :  { %5455 = sst [smem:[#allocation76_spill]] %s5392_s21 }
  0x17   :  { %26 = vsyncpa [#allocation3], 0 }
  0x18   :  { %28 = vsyncpa [#allocation3 + $0x1], 0 }
  0x19   :  { %29 = vsyncpa [#allocation6], 0 }
  0x1a   :  { %31 = vsyncpa [#allocation6 + $0x1], 0 }
  0x1b   :  { %32 = vsyncpa [#allocation9], 0 }
  0x1c   :  { %33 = vsyncpa [#allocation12], 0 }
  0x1d   :  { %34 = vsyncpa [#allocation15], 0 }
  0x1e   :  { %35 = vsyncpa [#allocation18], 0 }
  0x1f   :  { %36 = vsyncpa [#allocation21], 0 }
  0x20   :  { %37 = vsyncpa [#allocation24], 0 }
  0x21   :  { %38 = vsyncpa [#allocation27], 0 }
  0x22   :  { %39 = vsyncpa [#allocation30], 0 }
  0x23   :  { %40 = vsyncpa [#allocation33], 0 }
  0x24   :  { %41 = vsyncpa [#allocation4], 0 }
  0x25   :  { %43 = vsyncpa [#allocation4 + $0x1], 0  ;;  %s4521_s2 = smov 0   ;;  %s4523_s25 = smov 0  }
  0x26   :  { %s4525_s26 = smov 0   ;;  %s4527_s27 = smov 0  }
  0x27   :  { %s4529_s3 = smov 0   ;;  %s4531_s28 = smov 0  }
  0x28 LB: > { %5456 = sst [smem:[#allocation48_spill]] %s4373_s27  ;;  %s4552_s29 = sadd.s32 4294967295, %s4381_s28   ;;  %s4381_s28 = sphi %s4531_s28, %s49_s28   ;;  %s4377_s3 = sphi %s4529_s3, %s5534_s3   ;;  %s4373_s27 = sphi %s4527_s27, %s5533_s27   ;;  %s4369_s26 = sphi %s4525_s26, %s5537_s26   ;;  %s4365_s25 = sphi %s4523_s25, %s5536_s25   ;;  %s4361_s2 = sphi %s4521_s2, %s5535_s2  }
  0x29   : > { %5457 = sst [smem:[#allocation49_spill]] %s4377_s3  ;;  %p2968_p0 = scmp.ge.s32.totalorder %s4381_s28, 1 }
  0x2a   : > { %5458 = sst [smem:[#allocation50_spill]] %s4381_s28  ;;  %p5409_p1 = scmp.eq.s32.totalorder %s4552_s29, 0 }
  0x2b   : > { %p554_p2 = scmp.lt.s32.totalorder %s4381_s28, 3  ;;  %s4383_s4 = smov [#allocation8]  }
  0x2c   : > { %s566_s30 = sshll.u32 %s4383_s4, 4  ;;  %s4384_s22 = smov [#allocation11]   ;;  %s4561_s30 = int_to_ptr.vmem [resolvable:$true] %s566_s30 }
  0x2d   : > { %p4557_p3 = pnand %p2968_p0, %p554_p2  ;;  %s592_s23 = sshll.u32 %s4384_s22, 4  ;;  %s4572_s23 = int_to_ptr.vmem [resolvable:$true] %s592_s23 }
  0x2e   : > { %s4385_s1 = smov [#allocation14]   ;;  %s5462_s27 = sld [smem:[#allocation58_spill]] }
  0x2f   : > { %s5459_s0 = scalar_select %p4557_p3, 1, 0 }
  0x30   : > { %p3434_p4 = pneg %p4557_p3  ;;  %s4574_s24 = sshll.u32 %s4385_s1, 4  ;;  %s619_s24 = int_to_ptr.vmem [resolvable:$true] %s4574_s24 }
  0x31   : > { %5460 = sst [smem:[#allocation51_spill]] %s5459_s0 }
  0x32   : > { %p4568_p6 = pnand %p3434_p4, %p5409_p1 }
  0x34   : > { %s5461_s5 = scalar_select %p4568_p6, 1, 0 }
  0x35   : > { %s5463_s20 = smov %s5462_s27  ;;  %s3665_s18 = scalar_lea.hbm %s5462_s27, 1024 }
  0x36   : > { %p3666_p7 = scmp.ne.s32.totalorder %s5463_s20, %s3665_s18  ;;  %p4584_p8 = pneg %p4568_p6 }
  0x37   : > { %p3672_p11 = scmp.lt.u32.totalorder %s3665_s18, %s5463_s20 }
  0x38   : > { %s5464_s14 = scalar_select %p4584_p8, 1, 0 }
  0x39   : > { %p3668_p9 = pnand %p4584_p8, %p3666_p7 }
  0x3b   : > { %p3669_p10 = pneg %p3668_p9 }
  0x3d   : > { %p3674_p12 = pnand %p3672_p11, %p3669_p10 }
  0x3f   : > { %3677 = shalt.err (!%p3674_p12)
}
  0x40   : > { %s3678_s16 = scalar_lea.vmem %s4561_s30, 1024  ;;  %p3686_p4 = scmp.lt.s32.totalorder %s4561_s30, %s4561_s30 }
  0x41   : > { %p3679_p13 = scmp.ne.s32.totalorder %s4561_s30, %s3678_s16  ;;  %p3687_p5 = scmp.lt.s32.totalorder %s3678_s16, %s3678_s16 }
  0x43   : > { %p3681_p0 = pnand %p3679_p13, %p4584_p8  ;;  %p3688_p7 = por %p3687_p5, %p3686_p4 }
  0x45   : > { %p3682_p2 = pneg %p3681_p0 }
  0x47   : > { %p3689_p9 = pnand %p3688_p7, %p3682_p2 }
  0x49   : > { %3692 = shalt.err (!%p3689_p9)
}
  0x4a   : > { %s4386_s21 = smov 64   ;;  %s4387_s18 = smov 4  }
  0x4b   : > { %3437 = dma.hbm_to_vmem [thread:$0]  (!%p4568_p6), %s5463_s20, 1024, %s4561_s30, [#allocation9], %s4386_s21, %s4386_s21, %s4387_s18  }
  0x4c   : > { %s5465_s1 = sld [smem:[#allocation60_spill]] }
  0x52   : > { %s3693_s16 = scalar_lea.hbm %s5465_s1, 1024 }
  0x53   : > { %p3694_p5 = scmp.ne.s32.totalorder %s5465_s1, %s3693_s16  ;;  %p3700_p12 = scmp.lt.u32.totalorder %s3693_s16, %s5465_s1 }
  0x55   : > { %p3696_p10 = pnand %p3694_p5, %p4584_p8 }
  0x57   : > { %p3697_p11 = pneg %p3696_p10 }
  0x59   : > { %p3702_p13 = pnand %p3700_p12, %p3697_p11 }
  0x5b   : > { %3705 = shalt.err (!%p3702_p13)
}
  0x5c   : > { %s3706_s30 = scalar_lea.vmem %s4572_s23, 1024  ;;  %p3714_p7 = scmp.lt.s32.totalorder %s4572_s23, %s4572_s23 }
  0x5d   : > { %p3707_p0 = scmp.ne.s32.totalorder %s4572_s23, %s3706_s30  ;;  %p3715_p9 = scmp.lt.s32.totalorder %s3706_s30, %s3706_s30 }
  0x5f   : > { %p3709_p2 = pnand %p3707_p0, %p4584_p8  ;;  %p3716_p5 = por %p3715_p9, %p3714_p7 }
  0x61   : > { %p3710_p4 = pneg %p3709_p2 }
  0x63   : > { %p3717_p10 = pnand %p3716_p5, %p3710_p4 }
  0x65   : > { %3720 = shalt.err (!%p3717_p10)
}
  0x66   : > { %3443 = dma.hbm_to_vmem [thread:$0]  (!%p4568_p6), %s5465_s1, 1024, %s4572_s23, [#allocation12], %s4386_s21, %s4386_s21, %s4387_s18  }
  0x67   : > { %s5466_s7 = sld [smem:[#allocation62_spill]] }
  0x6d   : > { %s3721_s27 = scalar_lea.hbm %s5466_s7, 1024 }
  0x6e   : > { %p3722_p11 = scmp.ne.s32.totalorder %s5466_s7, %s3721_s27  ;;  %p3728_p0 = scmp.lt.u32.totalorder %s3721_s27, %s5466_s7 }
  0x70   : > { %p3724_p12 = pnand %p3722_p11, %p4584_p8 }
  0x72   : > { %p3725_p13 = pneg %p3724_p12 }
  0x74   : > { %p3730_p2 = pnand %p3728_p0, %p3725_p13 }
  0x76   : > { %3733 = shalt.err (!%p3730_p2)
}
  0x77   : > { %s3734_s30 = scalar_lea.vmem %s619_s24, 1024  ;;  %p3742_p5 = scmp.lt.s32.totalorder %s619_s24, %s619_s24 }
  0x78   : > { %p3735_p4 = scmp.ne.s32.totalorder %s619_s24, %s3734_s30  ;;  %p3743_p10 = scmp.lt.s32.totalorder %s3734_s30, %s3734_s30 }
  0x7a   : > { %p3737_p7 = pnand %p3735_p4, %p4584_p8  ;;  %p3744_p1 = por %p3743_p10, %p3742_p5 }
  0x7c   : > { %p3738_p9 = pneg %p3737_p7 }
  0x7e   : > { %p3745_p3 = pnand %p3744_p1, %p3738_p9 }
  0x80   : > { %3748 = shalt.err (!%p3745_p3)
}
  0x81   : > { %3449 = dma.hbm_to_vmem [thread:$0]  (!%p4568_p6), %s5466_s7, 1024, %s619_s24, [#allocation15], %s4386_s21, %s4386_s21, %s4387_s18  }
  0x82   : > { %s4388_s8 = smov [#allocation17]   ;;  %s4389_s12 = smov [#allocation20]  }
  0x83   : > { %s644_s10 = sshll.u32 %s4388_s8, 4  ;;  %s669_s27 = sshll.u32 %s4389_s12, 4  ;;  %s645_s10 = int_to_ptr.vmem [resolvable:$true] %s644_s10  ;;  %s670_s27 = int_to_ptr.vmem [resolvable:$true] %s669_s27 }
  0x84   : > { %s5467_s9 = sld [smem:[#allocation64_spill]] }
  0x8a   : > { %s3749_s22 = scalar_lea.hbm %s5467_s9, 256 }
  0x8b   : > { %p3750_p1 = scmp.ne.s32.totalorder %s5467_s9, %s3749_s22  ;;  %p3756_p12 = scmp.lt.u32.totalorder %s3749_s22, %s5467_s9 }
  0x8d   : > { %p3752_p3 = pnand %p3750_p1, %p4584_p8 }
  0x8f   : > { %p3753_p11 = pneg %p3752_p3 }
  0x91   : > { %p3758_p13 = pnand %p3756_p12, %p3753_p11 }
  0x93   : > { %3761 = shalt.err (!%p3758_p13)
}
  0x94   : > { %s3762_s24 = scalar_lea.vmem %s645_s10, 256  ;;  %p3770_p7 = scmp.lt.s32.totalorder %s645_s10, %s645_s10 }
  0x95   : > { %p3763_p0 = scmp.ne.s32.totalorder %s645_s10, %s3762_s24  ;;  %p3771_p9 = scmp.lt.s32.totalorder %s3762_s24, %s3762_s24 }
  0x97   : > { %p3765_p2 = pnand %p3763_p0, %p4584_p8  ;;  %p3772_p5 = por %p3771_p9, %p3770_p7 }
  0x99   : > { %p3766_p4 = pneg %p3765_p2 }
  0x9b   : > { %p3773_p10 = pnand %p3772_p5, %p3766_p4 }
  0x9d   : > { %3776 = shalt.err (!%p3773_p10)
}
  0x9e   : > { %3455 = dma.hbm_to_vmem [thread:$0]  (!%p4568_p6), %s5467_s9, 256, %s645_s10, [#allocation18], %s4386_s21, %s4386_s21, %s4387_s18  }
  0x9f   : > { %s5468_s11 = sld [smem:[#allocation66_spill]] }
  0xa5   : > { %s3777_s0 = scalar_lea.hbm %s5468_s11, 16 }
  0xa6   : > { %p3778_p1 = scmp.ne.s32.totalorder %s5468_s11, %s3777_s0  ;;  %p3784_p12 = scmp.lt.u32.totalorder %s3777_s0, %s5468_s11 }
  0xa8   : > { %p3780_p3 = pnand %p3778_p1, %p4584_p8 }
  0xaa   : > { %p3781_p11 = pneg %p3780_p3 }
  0xac   : > { %p3786_p13 = pnand %p3784_p12, %p3781_p11 }
  0xae   : > { %3789 = shalt.err (!%p3786_p13)
}
  0xaf   : > { %s3790_s23 = scalar_lea.vmem %s670_s27, 16  ;;  %s3797_s10 = scalar_lea.vmem %s670_s27, 32 }
  0xb0   : > { %p3791_p0 = scmp.ne.s32.totalorder %s670_s27, %s3790_s23  ;;  %p3798_p7 = scmp.lt.s32.totalorder %s670_s27, %s670_s27 }
  0xb1   : > { %p3799_p9 = scmp.lt.s32.totalorder %s3797_s10, %s3790_s23 }
  0xb2   : > { %p3793_p2 = pnand %p3791_p0, %p4584_p8 }
  0xb3   : > { %p3800_p5 = por %p3799_p9, %p3798_p7 }
  0xb4   : > { %p3794_p4 = pneg %p3793_p2 }
  0xb6   : > { %p3801_p10 = pnand %p3800_p5, %p3794_p4 }
  0xb8   : > { %3804 = shalt.err (!%p3801_p10)
}
  0xb9   : > { %3461 = dma.hbm_to_vmem [thread:$0]  (!%p4568_p6), %s5468_s11, 16, %s670_s27, [#allocation21]  }
  0xba   : > { %s4390_s6 = smov [#allocation23]   ;;  %s4391_s12 = smov [#allocation26]  }
  0xbb   : > { %s691_s8 = sshll.u32 %s4390_s6, 4  ;;  %s712_s0 = sshll.u32 %s4391_s12, 4  ;;  %s692_s8 = int_to_ptr.vmem [resolvable:$true] %s691_s8  ;;  %s713_s0 = int_to_ptr.vmem [resolvable:$true] %s712_s0 }
  0xbc   : > { %s5469_s13 = sld [smem:[#allocation68_spill]] }
  0xc2   : > { %s3805_s16 = scalar_lea.hbm %s5469_s13, 16 }
  0xc3   : > { %p3806_p1 = scmp.ne.s32.totalorder %s5469_s13, %s3805_s16  ;;  %p3812_p12 = scmp.lt.u32.totalorder %s3805_s16, %s5469_s13 }
  0xc5   : > { %p3808_p3 = pnand %p3806_p1, %p4584_p8 }
  0xc7   : > { %p3809_p11 = pneg %p3808_p3 }
  0xc9   : > { %p3814_p13 = pnand %p3812_p12, %p3809_p11 }
  0xcb   : > { %3817 = shalt.err (!%p3814_p13)
}
  0xcc   : > { %s3818_s27 = scalar_lea.vmem %s692_s8, 16  ;;  %s3825_s1 = scalar_lea.vmem %s692_s8, 32 }
  0xcd   : > { %p3819_p0 = scmp.ne.s32.totalorder %s692_s8, %s3818_s27  ;;  %p3826_p7 = scmp.lt.s32.totalorder %s692_s8, %s692_s8 }
  0xce   : > { %p3827_p9 = scmp.lt.s32.totalorder %s3825_s1, %s3818_s27 }
  0xcf   : > { %p3821_p2 = pnand %p3819_p0, %p4584_p8 }
  0xd0   : > { %p3828_p5 = por %p3827_p9, %p3826_p7 }
  0xd1   : > { %p3822_p4 = pneg %p3821_p2 }
  0xd3   : > { %p3829_p10 = pnand %p3828_p5, %p3822_p4 }
  0xd5   : > { %3832 = shalt.err (!%p3829_p10)
}
  0xd6   : > { %3467 = dma.hbm_to_vmem [thread:$0]  (!%p4568_p6), %s5469_s13, 16, %s692_s8, [#allocation24]  }
  0xd7   : > { %s5470_s15 = sld [smem:[#allocation70_spill]] }
  0xdd   : > { %s3833_s16 = scalar_lea.hbm %s5470_s15, 256 }
  0xde   : > { %p3834_p1 = scmp.ne.s32.totalorder %s5470_s15, %s3833_s16  ;;  %p3840_p12 = scmp.lt.u32.totalorder %s3833_s16, %s5470_s15 }
  0xe0   : > { %p3836_p3 = pnand %p3834_p1, %p4584_p8 }
  0xe2   : > { %p3837_p11 = pneg %p3836_p3 }
  0xe4   : > { %p3842_p13 = pnand %p3840_p12, %p3837_p11 }
  0xe6   : > { %3845 = shalt.err (!%p3842_p13)
}
  0xe7   : > { %s3846_s27 = scalar_lea.vmem %s713_s0, 256  ;;  %p3854_p7 = scmp.lt.s32.totalorder %s713_s0, %s713_s0 }
  0xe8   : > { %p3847_p0 = scmp.ne.s32.totalorder %s713_s0, %s3846_s27  ;;  %p3855_p9 = scmp.lt.s32.totalorder %s3846_s27, %s3846_s27 }
  0xea   : > { %p3849_p2 = pnand %p3847_p0, %p4584_p8  ;;  %p3856_p5 = por %p3855_p9, %p3854_p7 }
  0xec   : > { %p3850_p4 = pneg %p3849_p2 }
  0xee   : > { %p3857_p10 = pnand %p3856_p5, %p3850_p4 }
  0xf0   : > { %3860 = shalt.err (!%p3857_p10)
}
  0xf1   : > { %3473 = dma.hbm_to_vmem [thread:$0]  (!%p4568_p6), %s5470_s15, 256, %s713_s0, [#allocation27], %s4386_s21, %s4386_s21, %s4387_s18  }
  0xf2   : > { %s4392_s6 = smov [#allocation29]   ;;  %s4393_s4 = smov [#allocation32]  }
  0xf3   : > { %s736_s12 = sshll.u32 %s4392_s6, 4  ;;  %s761_s22 = sshll.u32 %s4393_s4, 4  ;;  %s737_s12 = int_to_ptr.vmem [resolvable:$true] %s736_s12  ;;  %s762_s22 = int_to_ptr.vmem [resolvable:$true] %s761_s22 }
  0xf4   : > { %s5471_s17 = sld [smem:[#allocation72_spill]] }
  0xfa   : > { %s3861_s23 = scalar_lea.hbm %s5471_s17, 512 }
  0xfb   : > { %p3862_p1 = scmp.ne.s32.totalorder %s5471_s17, %s3861_s23  ;;  %p3868_p12 = scmp.lt.u32.totalorder %s3861_s23, %s5471_s17 }
  0xfd   : > { %p3864_p3 = pnand %p3862_p1, %p4584_p8 }
  0xff   : > { %p3865_p11 = pneg %p3864_p3 }
 0x101   : > { %p3870_p13 = pnand %p3868_p12, %p3865_p11 }
 0x103   : > { %3873 = shalt.err (!%p3870_p13)
}
 0x104   : > { %s3874_s0 = scalar_lea.vmem %s737_s12, 512  ;;  %p3882_p7 = scmp.lt.s32.totalorder %s737_s12, %s737_s12 }
 0x105   : > { %p3875_p0 = scmp.ne.s32.totalorder %s737_s12, %s3874_s0  ;;  %p3883_p9 = scmp.lt.s32.totalorder %s3874_s0, %s3874_s0 }
 0x107   : > { %p3877_p2 = pnand %p3875_p0, %p4584_p8  ;;  %p3884_p5 = por %p3883_p9, %p3882_p7 }
 0x109   : > { %p3878_p4 = pneg %p3877_p2 }
 0x10b   : > { %p3885_p10 = pnand %p3884_p5, %p3878_p4 }
 0x10d   : > { %3888 = shalt.err (!%p3885_p10)
}
 0x10e   : > { %3479 = dma.hbm_to_vmem [thread:$0]  (!%p4568_p6), %s5471_s17, 512, %s737_s12, [#allocation30], %s4386_s21, %s4386_s21, %s4387_s18  }
 0x10f   : > { %s5472_s19 = sld [smem:[#allocation74_spill]] }
 0x115   : > { %s3889_s30 = scalar_lea.hbm %s5472_s19, 16 }
 0x116   : > { %p3890_p1 = scmp.ne.s32.totalorder %s5472_s19, %s3889_s30  ;;  %p3896_p12 = scmp.lt.u32.totalorder %s3889_s30, %s5472_s19 }
 0x118   : > { %p3892_p3 = pnand %p3890_p1, %p4584_p8 }
 0x11a   : > { %p3893_p11 = pneg %p3892_p3 }
 0x11c   : > { %p3898_p13 = pnand %p3896_p12, %p3893_p11 }
 0x11e   : > { %3901 = shalt.err (!%p3898_p13)
}
 0x11f   : > { %s3902_s8 = scalar_lea.vmem %s762_s22, 16  ;;  %s3909_s21 = scalar_lea.vmem %s762_s22, 32 }
 0x120   : > { %p3903_p0 = scmp.ne.s32.totalorder %s762_s22, %s3902_s8  ;;  %p3910_p7 = scmp.lt.s32.totalorder %s762_s22, %s762_s22 }
 0x121   : > { %p3911_p9 = scmp.lt.s32.totalorder %s3909_s21, %s3902_s8 }
 0x122   : > { %p3905_p2 = pnand %p3903_p0, %p4584_p8 }
 0x123   : > { %p3912_p5 = por %p3911_p9, %p3910_p7 }
 0x124   : > { %p3906_p4 = pneg %p3905_p2 }
 0x126   : > { %p3913_p10 = pnand %p3912_p5, %p3906_p4 }
 0x128   : > { %3916 = shalt.err (!%p3913_p10)
}
 0x129   : > { %3485 = dma.hbm_to_vmem [thread:$0]  (!%p4568_p6), %s5472_s19, 16, %s762_s22, [#allocation33]  }
 0x12a   : > { %s2967_s0 = sadd.s32 4294967294, %s4381_s28   ;;  %s61_s1 = sadd.s32 1, %s4377_s3 }
 0x12b   : > { %s70_s6 = sadd.s32 1, %s4369_s26  ;;  %p63_p1 = scmp.ge.s32.totalorder %s61_s1, 2 }
 0x12c   : > { %p77_p3 = scmp.ne.s32.totalorder %s4369_s26, %s4365_s25  ;;  %p78_p11 = scmp.eq.s32.totalorder %s4381_s28, 0 }
 0x12d   : > { %p83_p12 = scmp.ne.s32.totalorder %s4365_s25, %s4361_s2  ;;  %s5539_s1 = smov (%p63_p1, %s61_s1), 0 }
 0x12e   : > { %5473 = sst [smem:[#allocation52_spill]] %s5539_s1  ;;  %p4783_p13 = por %p78_p11, %p77_p3 }
 0x12f   : > { %p5475_p0 = scmp.eq.s32.totalorder %s4552_s29, 0  ;;  %s65_s16 = ssub.s32 %s4377_s3, %s5539_s1 }
 0x130   : > { %p541_p4 = scmp.eq.s32.totalorder %s4552_s29, 1  ;;  %p68_p7 = scmp.eq.s32.totalorder %s65_s16, 0 }
 0x131   : > { %p4789_p2 = por %p5475_p0, %p83_p12  ;;  %p547_p9 = scmp.eq.s32.totalorder %s2967_s0, 1 }
 0x132   : > { %p4796_p5 = por %p541_p4, %p77_p3  ;;  %p3521_p10 = scmp.lt.s32.totalorder %s4381_s28, 2 }
 0x133   : > { %s5476_s22 = scalar_select %p4789_p2, 1, 0 }
 0x134   : > { %s5477_s30 = scalar_select %p4796_p5, 1, 0 }
 0x135   : > { %s4802_s23 = scalar_select %p68_p7, %s4369_s26, %s70_s6  }
 0x136   : > { %p4804_p1 = por %p547_p9, %p83_p12  ;;  %s5412_s24 = sand.u32 1, %s4369_s26  }
 0x137   : > { %5478 = sst [smem:[#allocation53_spill]] %s4802_s23  ;;  %s4811_s27 = sshll.u32 %s5412_s24, 3 }
 0x138   : > { %s5479_s10 = scalar_select %p4804_p1, 1, 0 }
 0x139   : > { %s4814_s8 = sshll.u32 %s4377_s3, 7  ;;  %p4818_p3 = pnand %p3521_p10, %p4783_p13 }
 0x13a   : > { %5480 = sst [smem:[#allocation54_spill]] %s5479_s10  ;;  %s802_s18 = sand.u32 1, %s4381_s28  }
 0x13b   : > { %s5481_s21 = scalar_select %p4818_p3, 1, 0 }
 0x13c   : > { %s5482_s6 = sld [smem:[#allocation56_spill]]  ;;  %s806_s24 = scalar_lea.vmem [#allocation5], %s4811_s27 }
 0x13d   : > { %s813_s7 = sshll.u32 %s806_s24, 4  ;;  %s4394_s4 = smov [#allocation10]   ;;  %s4830_s7 = int_to_ptr.vmem [resolvable:$true] %s813_s7 }
 0x13e   : > { %s4832_s9 = sshll.u32 %s4394_s4, 4  ;;  %s4834_s11 = scalar_lea.sflag [#allocation6], %s802_s18  ;;  %s580_s9 = int_to_ptr.vmem [resolvable:$true] %s4832_s9 }
 0x13f   : > { %p4840_p12 = pneg %p4818_p3 }
 0x141   : > { %s5483_s12 = scalar_select %p4840_p12, 1, 0 }
 0x142   : > { %s4827_s16 = scalar_lea.hbm %s5482_s6, %s4814_s8  ;;  %s3922_s15 = scalar_lea.hbm %s5482_s6, 256 }
 0x143   : > { %s3917_s13 = scalar_lea.hbm %s4827_s16, 128  ;;  %p3923_p4 = scmp.lt.u32.totalorder %s4827_s16, %s5482_s6 }
 0x144   : > { %p3918_p11 = scmp.ne.s32.totalorder %s4827_s16, %s3917_s13  ;;  %p3924_p7 = scmp.lt.u32.totalorder %s3922_s15, %s3917_s13 }
 0x145   : > { %p3926_p10 = scmp.lt.u32.totalorder %s3917_s13, %s4827_s16 }
 0x146   : > { %p3920_p13 = pnand %p4840_p12, %p3918_p11  ;;  %p3925_p9 = por %p3924_p7, %p3923_p4 }
 0x148   : > { %p3921_p0 = pneg %p3920_p13  ;;  %p3927_p1 = por %p3926_p10, %p3925_p9 }
 0x14a   : > { %p3928_p5 = pnand %p3927_p1, %p3921_p0 }
 0x14c   : > { %3931 = shalt.err (!%p3928_p5)
}
 0x14d   : > { %s3932_s18 = scalar_lea.vmem %s4830_s7, 128  ;;  %s4395_s0 = smov [#allocation5]  }
 0x14e   : > { %p3933_p11 = scmp.ne.s32.totalorder %s4830_s7, %s3932_s18  ;;  %s3937_s24 = sshll.u32 %s4395_s0, 4  ;;  %s3938_s24 = int_to_ptr.vmem [resolvable:$false] %s3937_s24 }
 0x14f   : > { %s3939_s17 = scalar_lea.vmem %s3938_s24, 256  ;;  %p3940_p6 = scmp.lt.s32.totalorder %s4830_s7, %s3938_s24 }
 0x150   : > { %p3935_p13 = pnand %p3933_p11, %p4840_p12  ;;  %p3941_p8 = scmp.lt.s32.totalorder %s3939_s17, %s3932_s18 }
 0x152   : > { %p3936_p2 = pneg %p3935_p13  ;;  %p3942_p4 = por %p3941_p8, %p3940_p6 }
 0x154   : > { %p3943_p7 = pnand %p3942_p4, %p3936_p2 }
 0x156   : > { %3946 = shalt.err (!%p3943_p7)
}
 0x157   : > { %3495 = dma.hbm_to_vmem [thread:$0]  (!%p4818_p3), %s4827_s16, 128, %s4830_s7, %s4834_s11  }
 0x158   : > { %s5484_s4 = sld [smem:[#allocation59_spill]]  ;;  %p5485_p6 = scmp.ne.s32.totalorder %s5464_s14, 0 }
 0x15e   : > { %s3947_s0 = scalar_lea.hbm %s5484_s4, 64 }
 0x15f   : > { %p3948_p5 = scmp.ne.s32.totalorder %s5484_s4, %s3947_s0  ;;  %p3954_p1 = scmp.lt.u32.totalorder %s3947_s0, %s5484_s4 }
 0x161   : > { %p3950_p8 = pnand %p3948_p5, %p5485_p6 }
 0x163   : > { %p3951_p2 = pneg %p3950_p8 }
 0x165   : > { %p3956_p0 = pnand %p3954_p1, %p3951_p2 }
 0x167   : > { %3959 = shalt.err (!%p3956_p0)
}
 0x168   : > { %s3960_s17 = scalar_lea.vmem %s580_s9, 64  ;;  %p3968_p13 = scmp.lt.s32.totalorder %s580_s9, %s580_s9 }
 0x169   : > { %p3961_p9 = scmp.ne.s32.totalorder %s580_s9, %s3960_s17  ;;  %p3969_p4 = scmp.lt.s32.totalorder %s3960_s17, %s3960_s17 }
 0x16b   : > { %p3963_p10 = pnand %p3961_p9, %p5485_p6  ;;  %p3970_p7 = por %p3969_p4, %p3968_p13 }
 0x16d   : > { %p3964_p11 = pneg %p3963_p10 }
 0x16f   : > { %p3971_p3 = pnand %p3970_p7, %p3964_p11 }
 0x171   : > { %3974 = shalt.err (!%p3971_p3)
}
 0x172   : > { %s4396_s7 = smov 16   ;;  %s4397_s19 = smov 1  }
 0x173   : > { %p5486_p5 = scmp.ne.s32.totalorder %s5461_s5, 0  ;;  %s4398_s13 = smov [#allocation13]  }
 0x174   : > { %s605_s15 = sshll.u32 %s4398_s13, 4  ;;  %s4399_s0 = smov [#allocation16]   ;;  %s606_s15 = int_to_ptr.vmem [resolvable:$true] %s605_s15 }
 0x175   : > { %3440 = dma.hbm_to_vmem [thread:$0]  (!%p5486_p5), %s5484_s4, 64, %s580_s9, [#allocation9], %s4396_s7, %s4396_s7, %s4397_s19  }
 0x176   : > { %s631_s18 = sshll.u32 %s4399_s0, 4  ;;  %s5487_s20 = sld [smem:[#allocation61_spill]]  ;;  %s632_s18 = int_to_ptr.vmem [resolvable:$true] %s631_s18 }
 0x17c   : > { %s3975_s1 = scalar_lea.hbm %s5487_s20, 64 }
 0x17d   : > { %p3976_p3 = scmp.ne.s32.totalorder %s5487_s20, %s3975_s1  ;;  %p3982_p1 = scmp.lt.u32.totalorder %s3975_s1, %s5487_s20 }
 0x17f   : > { %p3978_p8 = pnand %p3976_p3, %p5485_p6 }
 0x181   : > { %p3979_p2 = pneg %p3978_p8 }
 0x183   : > { %p3984_p0 = pnand %p3982_p1, %p3979_p2 }
 0x185   : > { %3987 = shalt.err (!%p3984_p0)
}
 0x186   : > { %s3988_s9 = scalar_lea.vmem %s606_s15, 64  ;;  %p3996_p13 = scmp.lt.s32.totalorder %s606_s15, %s606_s15 }
 0x187   : > { %p3989_p9 = scmp.ne.s32.totalorder %s606_s15, %s3988_s9  ;;  %p3997_p4 = scmp.lt.s32.totalorder %s3988_s9, %s3988_s9 }
 0x189   : > { %p3991_p10 = pnand %p3989_p9, %p5485_p6  ;;  %p3998_p7 = por %p3997_p4, %p3996_p13 }
 0x18b   : > { %p3992_p11 = pneg %p3991_p10 }
 0x18d   : > { %p3999_p12 = pnand %p3998_p7, %p3992_p11 }
 0x18f   : > { %4002 = shalt.err (!%p3999_p12)
}
 0x190   : > { %3446 = dma.hbm_to_vmem [thread:$0]  (!%p5486_p5), %s5487_s20, 64, %s606_s15, [#allocation12], %s4396_s7, %s4396_s7, %s4397_s19  }
 0x191   : > { %s5488_s10 = sld [smem:[#allocation63_spill]] }
 0x197   : > { %s4003_s6 = scalar_lea.hbm %s5488_s10, 64 }
 0x198   : > { %p4004_p3 = scmp.ne.s32.totalorder %s5488_s10, %s4003_s6  ;;  %p4010_p2 = scmp.lt.u32.totalorder %s4003_s6, %s5488_s10 }
 0x19a   : > { %p4006_p12 = pnand %p4004_p3, %p5485_p6 }
 0x19c   : > { %p4007_p8 = pneg %p4006_p12 }
 0x19e   : > { %p4012_p1 = pnand %p4010_p2, %p4007_p8 }
 0x1a0   : > { %4015 = shalt.err (!%p4012_p1)
}
 0x1a1   : > { %s4016_s17 = scalar_lea.vmem %s632_s18, 64  ;;  %p4024_p11 = scmp.lt.s32.totalorder %s632_s18, %s632_s18 }
 0x1a2   : > { %p4017_p0 = scmp.ne.s32.totalorder %s632_s18, %s4016_s17  ;;  %p4025_p13 = scmp.lt.s32.totalorder %s4016_s17, %s4016_s17 }
 0x1a4   : > { %p4019_p9 = pnand %p4017_p0, %p5485_p6  ;;  %p4026_p4 = por %p4025_p13, %p4024_p11 }
 0x1a6   : > { %p4020_p10 = pneg %p4019_p9 }
 0x1a8   : > { %p4027_p7 = pnand %p4026_p4, %p4020_p10 }
 0x1aa   : > { %4030 = shalt.err (!%p4027_p7)
}
 0x1ab   : > { %3452 = dma.hbm_to_vmem [thread:$0]  (!%p5486_p5), %s5488_s10, 64, %s632_s18, [#allocation15], %s4396_s7, %s4396_s7, %s4397_s19  }
 0x1ac   : > { %s4400_s3 = smov [#allocation19]   ;;  %s4401_s1 = smov [#allocation22]  }
 0x1ad   : > { %s658_s28 = sshll.u32 %s4400_s3, 4  ;;  %s680_s23 = sshll.u32 %s4401_s1, 4  ;;  %s659_s28 = int_to_ptr.vmem [resolvable:$true] %s658_s28  ;;  %s681_s23 = int_to_ptr.vmem [resolvable:$true] %s680_s23 }
 0x1ae   : > { %s5489_s13 = sld [smem:[#allocation65_spill]] }
 0x1b4   : > { %s4031_s0 = scalar_lea.hbm %s5489_s13, 16 }
 0x1b5   : > { %p4032_p3 = scmp.ne.s32.totalorder %s5489_s13, %s4031_s0  ;;  %p4038_p2 = scmp.lt.u32.totalorder %s4031_s0, %s5489_s13 }
 0x1b7   : > { %p4034_p12 = pnand %p4032_p3, %p5485_p6 }
 0x1b9   : > { %p4035_p8 = pneg %p4034_p12 }
 0x1bb   : > { %p4040_p1 = pnand %p4038_p2, %p4035_p8 }
 0x1bd   : > { %4043 = shalt.err (!%p4040_p1)
}
 0x1be   : > { %s4044_s7 = scalar_lea.vmem %s659_s28, 16  ;;  %s4051_s19 = scalar_lea.vmem %s659_s28, 32 }
 0x1bf   : > { %p4045_p0 = scmp.ne.s32.totalorder %s659_s28, %s4044_s7  ;;  %p4052_p11 = scmp.lt.s32.totalorder %s659_s28, %s659_s28 }
 0x1c0   : > { %p4053_p13 = scmp.lt.s32.totalorder %s4051_s19, %s4044_s7 }
 0x1c1   : > { %p4047_p9 = pnand %p4045_p0, %p5485_p6 }
 0x1c2   : > { %p4054_p4 = por %p4053_p13, %p4052_p11 }
 0x1c3   : > { %p4048_p10 = pneg %p4047_p9 }
 0x1c5   : > { %p4055_p7 = pnand %p4054_p4, %p4048_p10 }
 0x1c7   : > { %4058 = shalt.err (!%p4055_p7)
}
 0x1c8   : > { %3458 = dma.hbm_to_vmem [thread:$0]  (!%p5486_p5), %s5489_s13, 16, %s659_s28, [#allocation18]  }
 0x1c9   : > { %s5490_s1 = sld [smem:[#allocation67_spill]] }
 0x1cf   : > { %s4059_s6 = scalar_lea.hbm %s5490_s1, 16 }
 0x1d0   : > { %p4060_p3 = scmp.ne.s32.totalorder %s5490_s1, %s4059_s6  ;;  %p4066_p2 = scmp.lt.u32.totalorder %s4059_s6, %s5490_s1 }
 0x1d2   : > { %p4062_p12 = pnand %p4060_p3, %p5485_p6 }
 0x1d4   : > { %p4063_p8 = pneg %p4062_p12 }
 0x1d6   : > { %p4068_p1 = pnand %p4066_p2, %p4063_p8 }
 0x1d8   : > { %4071 = shalt.err (!%p4068_p1)
}
 0x1d9   : > { %s4072_s15 = scalar_lea.vmem %s681_s23, 16  ;;  %s4079_s28 = scalar_lea.vmem %s681_s23, 32 }
 0x1da   : > { %p4073_p0 = scmp.ne.s32.totalorder %s681_s23, %s4072_s15  ;;  %p4080_p11 = scmp.lt.s32.totalorder %s681_s23, %s681_s23 }
 0x1db   : > { %p4081_p13 = scmp.lt.s32.totalorder %s4079_s28, %s4072_s15 }
 0x1dc   : > { %p4075_p9 = pnand %p4073_p0, %p5485_p6 }
 0x1dd   : > { %p4082_p4 = por %p4081_p13, %p4080_p11 }
 0x1de   : > { %p4076_p10 = pneg %p4075_p9 }
 0x1e0   : > { %p4083_p7 = pnand %p4082_p4, %p4076_p10 }
 0x1e2   : > { %4086 = shalt.err (!%p4083_p7)
}
 0x1e3   : > { %3464 = dma.hbm_to_vmem [thread:$0]  (!%p5486_p5), %s5490_s1, 16, %s681_s23, [#allocation21]  }
 0x1e4   : > { %s4402_s18 = smov [#allocation25]   ;;  %s4403_s4 = smov [#allocation28]  }
 0x1e5   : > { %s702_s9 = sshll.u32 %s4402_s18, 4  ;;  %s726_s3 = sshll.u32 %s4403_s4, 4  ;;  %s703_s9 = int_to_ptr.vmem [resolvable:$true] %s702_s9  ;;  %s727_s3 = int_to_ptr.vmem [resolvable:$true] %s726_s3 }
 0x1e6   : > { %s5491_s0 = sld [smem:[#allocation69_spill]] }
 0x1ec   : > { %s4087_s24 = scalar_lea.hbm %s5491_s0, 16 }
 0x1ed   : > { %p4088_p3 = scmp.ne.s32.totalorder %s5491_s0, %s4087_s24  ;;  %p4094_p2 = scmp.lt.u32.totalorder %s4087_s24, %s5491_s0 }
 0x1ef   : > { %p4090_p12 = pnand %p4088_p3, %p5485_p6 }
 0x1f1   : > { %p4091_p8 = pneg %p4090_p12 }
 0x1f3   : > { %p4096_p1 = pnand %p4094_p2, %p4091_p8 }
 0x1f5   : > { %4099 = shalt.err (!%p4096_p1)
}
 0x1f6   : > { %s4100_s23 = scalar_lea.vmem %s703_s9, 16  ;;  %s4107_s19 = scalar_lea.vmem %s703_s9, 32 }
 0x1f7   : > { %p4101_p0 = scmp.ne.s32.totalorder %s703_s9, %s4100_s23  ;;  %p4108_p11 = scmp.lt.s32.totalorder %s703_s9, %s703_s9 }
 0x1f8   : > { %p4109_p13 = scmp.lt.s32.totalorder %s4107_s19, %s4100_s23 }
 0x1f9   : > { %p4103_p9 = pnand %p4101_p0, %p5485_p6 }
 0x1fa   : > { %p4110_p4 = por %p4109_p13, %p4108_p11 }
 0x1fb   : > { %p4104_p10 = pneg %p4103_p9 }
 0x1fd   : > { %p4111_p7 = pnand %p4110_p4, %p4104_p10 }
 0x1ff   : > { %4114 = shalt.err (!%p4111_p7)
}
 0x200   : > { %3470 = dma.hbm_to_vmem [thread:$0]  (!%p5486_p5), %s5491_s0, 16, %s703_s9, [#allocation24]  }
 0x201   : > { %s5492_s24 = sld [smem:[#allocation71_spill]] }
 0x207   : > { %s4115_s17 = scalar_lea.hbm %s5492_s24, 16 }
 0x208   : > { %p4116_p3 = scmp.ne.s32.totalorder %s5492_s24, %s4115_s17  ;;  %p4122_p2 = scmp.lt.u32.totalorder %s4115_s17, %s5492_s24 }
 0x20a   : > { %p4118_p12 = pnand %p4116_p3, %p5485_p6 }
 0x20c   : > { %p4119_p8 = pneg %p4118_p12 }
 0x20e   : > { %p4124_p1 = pnand %p4122_p2, %p4119_p8 }
 0x210   : > { %4127 = shalt.err (!%p4124_p1)
}
 0x211   : > { %s4128_s19 = scalar_lea.vmem %s727_s3, 16  ;;  %s4135_s9 = scalar_lea.vmem %s727_s3, 32 }
 0x212   : > { %p4129_p0 = scmp.ne.s32.totalorder %s727_s3, %s4128_s19  ;;  %p4136_p11 = scmp.lt.s32.totalorder %s727_s3, %s727_s3 }
 0x213   : > { %p4137_p13 = scmp.lt.s32.totalorder %s4135_s9, %s4128_s19 }
 0x214   : > { %p4131_p9 = pnand %p4129_p0, %p5485_p6 }
 0x215   : > { %p4138_p4 = por %p4137_p13, %p4136_p11 }
 0x216   : > { %p4132_p10 = pneg %p4131_p9 }
 0x218   : > { %p4139_p7 = pnand %p4138_p4, %p4132_p10 }
 0x21a   : > { %4142 = shalt.err (!%p4139_p7)
}
 0x21b   : > { %3476 = dma.hbm_to_vmem [thread:$0]  (!%p5486_p5), %s5492_s24, 16, %s727_s3, [#allocation27]  }
 0x21c   : > { %s4404_s6 = smov [#allocation31]   ;;  %s4405_s17 = smov [#allocation34]  }
 0x21d   : > { %s750_s16 = sshll.u32 %s4404_s6, 4  ;;  %s772_s15 = sshll.u32 %s4405_s17, 4  ;;  %s751_s16 = int_to_ptr.vmem [resolvable:$true] %s750_s16  ;;  %s773_s15 = int_to_ptr.vmem [resolvable:$true] %s772_s15 }
 0x21e   : > { %s5493_s23 = sld [smem:[#allocation73_spill]] }
 0x224   : > { %s4143_s0 = scalar_lea.hbm %s5493_s23, 16 }
 0x225   : > { %p4144_p3 = scmp.ne.s32.totalorder %s5493_s23, %s4143_s0  ;;  %p4150_p2 = scmp.lt.u32.totalorder %s4143_s0, %s5493_s23 }
 0x227   : > { %p4146_p12 = pnand %p4144_p3, %p5485_p6 }
 0x229   : > { %p4147_p8 = pneg %p4146_p12 }
 0x22b   : > { %p4152_p1 = pnand %p4150_p2, %p4147_p8 }
 0x22d   : > { %4155 = shalt.err (!%p4152_p1)
}
 0x22e   : > { %s4156_s3 = scalar_lea.vmem %s751_s16, 16  ;;  %s4163_s4 = scalar_lea.vmem %s751_s16, 32 }
 0x22f   : > { %p4157_p0 = scmp.ne.s32.totalorder %s751_s16, %s4156_s3  ;;  %p4164_p11 = scmp.lt.s32.totalorder %s751_s16, %s751_s16 }
 0x230   : > { %p4165_p13 = scmp.lt.s32.totalorder %s4163_s4, %s4156_s3 }
 0x231   : > { %p4159_p9 = pnand %p4157_p0, %p5485_p6 }
 0x232   : > { %p4166_p4 = por %p4165_p13, %p4164_p11 }
 0x233   : > { %p4160_p10 = pneg %p4159_p9 }
 0x235   : > { %p4167_p7 = pnand %p4166_p4, %p4160_p10 }
 0x237   : > { %4170 = shalt.err (!%p4167_p7)
}
 0x238   : > { %3482 = dma.hbm_to_vmem [thread:$0]  (!%p5486_p5), %s5493_s23, 16, %s751_s16, [#allocation30]  }
 0x239   : > { %s5494_s28 = sld [smem:[#allocation75_spill]] }
 0x23f   : > { %s5495_s7 = smov %s5494_s28  ;;  %s4171_s19 = scalar_lea.hbm %s5494_s28, 16 }
 0x240   : > { %p4172_p3 = scmp.ne.s32.totalorder %s5495_s7, %s4171_s19  ;;  %p4178_p2 = scmp.lt.u32.totalorder %s4171_s19, %s5495_s7 }
 0x242   : > { %p4174_p12 = pnand %p4172_p3, %p5485_p6 }
 0x244   : > { %p4175_p8 = pneg %p4174_p12 }
 0x246   : > { %p4180_p1 = pnand %p4178_p2, %p4175_p8 }
 0x248   : > { %4183 = shalt.err (!%p4180_p1)
}
 0x249   : > { %s4184_s6 = scalar_lea.vmem %s773_s15, 16  ;;  %s4191_s16 = scalar_lea.vmem %s773_s15, 32 }
 0x24a   : > { %p4185_p0 = scmp.ne.s32.totalorder %s773_s15, %s4184_s6  ;;  %p4192_p11 = scmp.lt.s32.totalorder %s773_s15, %s773_s15 }
 0x24b   : > { %p4193_p13 = scmp.lt.s32.totalorder %s4191_s16, %s4184_s6 }
 0x24c   : > { %p4187_p9 = pnand %p4185_p0, %p5485_p6 }
 0x24d   : > { %p4194_p4 = por %p4193_p13, %p4192_p11 }
 0x24e   : > { %p4188_p10 = pneg %p4187_p9 }
 0x250   : > { %p4195_p7 = pnand %p4194_p4, %p4188_p10 }
 0x252   : > { %4198 = shalt.err (!%p4195_p7)
}
 0x253   : > { %3488 = dma.hbm_to_vmem [thread:$0]  (!%p5486_p5), %s5495_s7, 16, %s773_s15, [#allocation33]  }
 0x254   : > { %s5496_s28 = sld [smem:[#allocation55_spill]]  ;;  %s787_s18 = scalar_lea.vmem [#allocation2], %s4811_s27 }
 0x255   : > { %s795_s5 = sshll.u32 %s787_s18, 4  ;;  %s5498_s6 = sld [smem:[#allocation57_spill]]  ;;  %s5043_s5 = int_to_ptr.vmem [resolvable:$true] %s795_s5 }
 0x256   : > { %s5499_s17 = sand.u32 1, %s4369_s26   ;;  %p5500_p5 = scmp.ne.s32.totalorder %s5483_s12, 0 }
 0x257   : > { %s784_s15 = scalar_lea.sflag [#allocation3], %s5499_s17 }
 0x25a   : > { %s5497_s19 = smov %s5496_s28  ;;  %s5040_s9 = scalar_lea.hbm %s5496_s28, %s4814_s8 }
 0x25b   : > { %s5049_s16 = scalar_lea.hbm %s5498_s6, %s4814_s8  ;;  %s4199_s1 = scalar_lea.hbm %s5040_s9, 128 }
 0x25c   : > { %p4200_p6 = scmp.ne.s32.totalorder %s5040_s9, %s4199_s1  ;;  %s4204_s28 = scalar_lea.hbm %s5497_s19, 256 }
 0x25d   : > { %p4205_p8 = scmp.lt.u32.totalorder %s5040_s9, %s5497_s19  ;;  %p4206_p2 = scmp.lt.u32.totalorder %s4204_s28, %s4199_s1 }
 0x25e   : > { %p4202_p3 = pnand %p4200_p6, %p5500_p5  ;;  %p4208_p0 = scmp.lt.u32.totalorder %s4199_s1, %s5040_s9 }
 0x25f   : > { %p4207_p1 = por %p4206_p2, %p4205_p8 }
 0x260   : > { %p4203_p12 = pneg %p4202_p3 }
 0x261   : > { %p4209_p9 = por %p4208_p0, %p4207_p1 }
 0x263   : > { %p4210_p10 = pnand %p4209_p9, %p4203_p12 }
 0x265   : > { %4213 = shalt.err (!%p4210_p10)
}
 0x266   : > { %s4214_s8 = scalar_lea.vmem %s5043_s5, 128  ;;  %s4406_s3 = smov [#allocation2]  }
 0x267   : > { %p4215_p11 = scmp.ne.s32.totalorder %s5043_s5, %s4214_s8  ;;  %s4219_s4 = sshll.u32 %s4406_s3, 4  ;;  %s4220_s4 = int_to_ptr.vmem [resolvable:$false] %s4219_s4 }
 0x268   : > { %s4221_s7 = scalar_lea.vmem %s4220_s4, 256  ;;  %p4222_p7 = scmp.lt.s32.totalorder %s5043_s5, %s4220_s4 }
 0x269   : > { %p4217_p13 = pnand %p4215_p11, %p5500_p5  ;;  %p4223_p6 = scmp.lt.s32.totalorder %s4221_s7, %s4214_s8 }
 0x26b   : > { %p4218_p4 = pneg %p4217_p13  ;;  %p4224_p3 = por %p4223_p6, %p4222_p7 }
 0x26d   : > { %p4225_p8 = pnand %p4224_p3, %p4218_p4 }
 0x26f   : > { %4228 = shalt.err (!%p4225_p8)
}
 0x270   : > { %p5501_p12 = scmp.ne.s32.totalorder %s5481_s21, 0  ;;  %s824_s17 = scalar_lea.vmem [#allocation7], %s4811_s27 }
 0x271   : > { %s832_s1 = sshll.u32 %s824_s17, 4  ;;  %s4229_s14 = scalar_lea.hbm %s5049_s16, 128  ;;  %s833_s1 = int_to_ptr.vmem [resolvable:$true] %s832_s1 }
 0x272   : > { %3492 = dma.hbm_to_vmem [thread:$0]  (!%p5501_p12), %s5040_s9, 128, %s5043_s5, %s784_s15  }
 0x273   : > { %p4230_p2 = scmp.ne.s32.totalorder %s5049_s16, %s4229_s14  ;;  %s4234_s18 = scalar_lea.hbm %s5498_s6, 256 }
 0x274   : > { %p4235_p9 = scmp.lt.u32.totalorder %s5049_s16, %s5498_s6  ;;  %p4236_p10 = scmp.lt.u32.totalorder %s4234_s18, %s4229_s14 }
 0x275   : > { %p4232_p1 = pnand %p4230_p2, %p5500_p5  ;;  %p4238_p13 = scmp.lt.u32.totalorder %s4229_s14, %s5049_s16 }
 0x276   : > { %p4237_p11 = por %p4236_p10, %p4235_p9 }
 0x277   : > { %p4233_p0 = pneg %p4232_p1 }
 0x278   : > { %p4239_p4 = por %p4238_p13, %p4237_p11 }
 0x27a   : > { %p4240_p7 = pnand %p4239_p4, %p4233_p0 }
 0x27c   : > { %4243 = shalt.err (!%p4240_p7)
}
 0x27d   : > { %s4244_s27 = scalar_lea.vmem %s833_s1, 128  ;;  %s4407_s9 = smov [#allocation7]  }
 0x27e   : > { %p4245_p6 = scmp.ne.s32.totalorder %s833_s1, %s4244_s27  ;;  %s4249_s5 = sshll.u32 %s4407_s9, 4  ;;  %s4250_s5 = int_to_ptr.vmem [resolvable:$false] %s4249_s5 }
 0x27f   : > { %s4251_s15 = scalar_lea.vmem %s4250_s5, 256  ;;  %p4252_p2 = scmp.lt.s32.totalorder %s833_s1, %s4250_s5 }
 0x280   : > { %p4247_p3 = pnand %p4245_p6, %p5500_p5  ;;  %p4253_p1 = scmp.lt.s32.totalorder %s4251_s15, %s4244_s27 }
 0x282   : > { %p4248_p8 = pneg %p4247_p3  ;;  %p4254_p12 = por %p4253_p1, %p4252_p2 }
 0x284   : > { %p4255_p9 = pnand %p4254_p12, %p4248_p8 }
 0x286   : > { %4258 = shalt.err (!%p4255_p9)
}
 0x287   : > { %p5502_p10 = scmp.ne.s32.totalorder %s5481_s21, 0  ;;  %s5503_s4 = sld [smem:[#allocation51_spill]] }
 0x289   : > { %3498 = dma.hbm_to_vmem [thread:$0]  (!%p5502_p10), %s5049_s16, 128, %s833_s1, %s4834_s11  }
 0x28d   : > { %p5504_p0 = scmp.ne.s32.totalorder %s5503_s4, 0 }
 0x28e   : > { %s5096_s12 = sand.u32 (!%p5504_p0), 1, %s4365_s25   ;;  %p5505_p5 = scmp.ne.s32.totalorder (!%p5504_p0), %s5476_s22, 0 }
 0x28f   : > { %841 = sbr.rel (%p5504_p0) target bundleno = 3309 (0xced), region = 104  ;;  %s5099_s7 = sshll.u32 (!%p5504_p0), %s5096_s12, 3 }
 0x290   : > { %s844_s17 = scalar_lea.sflag (!%p5504_p0), [#allocation3], %s5096_s12  ;;  %s847_s14 = scalar_lea.vmem (!%p5504_p0), [#allocation2], %s5099_s7 }
 0x296   : > { %4312 = dma.done.wait (%p5505_p5), %s844_s17, 128  }
 0x297   : > { %4314 = vsyncadd (%p5505_p5), %s844_s17, 4294967168  ;;  %s852_s11 = sand.u32 1, %s4552_s29   ;;  %s856_s16 = scalar_lea.vmem [#allocation5], %s5099_s7 }
 0x298   : > { %s853_s21 = scalar_lea.sflag [#allocation6], %s852_s11 }
 0x299   : > { %4316 = dma.done.wait (%p5505_p5), %s853_s21, 256  }
 0x29a   : > { %4318 = vsyncadd (%p5505_p5), %s853_s21, 4294967040  ;;  %s865_s1 = scalar_lea.vmem [#allocation7], %s5099_s7  ;;  %p5506_p12 = scmp.eq.s32.totalorder %s4552_s29, 0 }
 0x29c   : > { %4320 = dma.done.wait (%p5506_p12), [#allocation9], 1088   ;;  %p5507_p11 = pmov %p5506_p12 }
 0x29e   : > { %4322 = vsyncadd (%p5507_p11), [#allocation9], 4294966208  ;;  %p5508_p13 = pmov %p5507_p11 }
 0x29f   : > { %p5509_p4 = pmov %p5507_p11 }
 0x2a0   : > { %4324 = dma.done.wait (%p5508_p13), [#allocation12], 1088  }
 0x2a1   : > { %4326 = vsyncadd (%p5509_p4), [#allocation12], 4294966208  ;;  %p5510_p7 = pmov %p5509_p4 }
 0x2a2   : > { %p5511_p6 = pmov %p5509_p4 }
 0x2a3   : > { %4328 = dma.done.wait (%p5510_p7), [#allocation15], 1088  }
 0x2a4   : > { %4330 = vsyncadd (%p5511_p6), [#allocation15], 4294966208  ;;  %p5512_p3 = pmov %p5509_p4 }
 0x2a6   : > { %4332 = dma.done.wait (%p5512_p3), [#allocation18], 272   ;;  %p5513_p8 = pmov %p5512_p3 }
 0x2a7   : > { %p5514_p2 = pmov %p5512_p3 }
 0x2a8   : > { %4334 = vsyncadd (%p5513_p8), [#allocation18], 4294967024 }
 0x2a9   : > { %4336 = dma.done.wait (%p5514_p2), [#allocation21], 32   ;;  %p5515_p1 = pmov %p5514_p2 }
 0x2ab   : > { %4338 = vsyncadd (%p5515_p1), [#allocation21], 4294967264  ;;  %p5516_p9 = pmov %p5515_p1 }
 0x2ac   : > { %p5517_p10 = pmov %p5515_p1 }
 0x2ad   : > { %4340 = dma.done.wait (%p5516_p9), [#allocation24], 32  }
 0x2ae   : > { %4342 = vsyncadd (%p5517_p10), [#allocation24], 4294967264  ;;  %p5518_p0 = pmov %p5515_p1 }
 0x2b0   : > { %4344 = dma.done.wait (%p5518_p0), [#allocation27], 272   ;;  %p5519_p5 = pmov %p5518_p0 }
 0x2b1   : > { %p5520_p12 = pmov %p5518_p0 }
 0x2b2   : > { %4346 = vsyncadd (%p5519_p5), [#allocation27], 4294967024 }
 0x2b3   : > { %4348 = dma.done.wait (%p5520_p12), [#allocation30], 528   ;;  %p5521_p11 = pmov %p5518_p0 }
 0x2b4   : > { %p5522_p13 = pmov %p5518_p0 }
 0x2b5   : > { %4350 = vsyncadd (%p5521_p11), [#allocation30], 4294966768 }
 0x2b6   : > { %4352 = dma.done.wait (%p5522_p13), [#allocation33], 32   ;;  %p5523_p4 = pmov %p5518_p0 }
 0x2b7   : > { %v4408_v0 = vmov 0.0   ;;  %vm4409_vm0 = vmmov 0   ;;  %v3613_v1 = vld [vmem:[#allocation8] sm:$0xff]   ;;  %v3614_v2 = vld [vmem:[#allocation8 + $0x10] sm:$0xff]   ;;  %v3615_v3 = vld [vmem:[#allocation8 + $0x8] sm:$0xff]   ;;  %vm1068_vm1 = vcmask 261120  }
 0x2b8   : > { %4354 = vsyncadd (%p5523_p4), [#allocation33], 4294967264  ;;  %3166 = vmatprep.subr.bf16.mxu0 %v4408_v0  ;;  %3174 = vmatprep.subr.bf16.mxu1 %v4408_v0  ;;  %v3616_v4 = vld [vmem:[#allocation8 + $0x18] sm:$0xff]   ;;  %v3617_v7 = vld [vmem:[#allocation8 + $0x20] sm:$0xff]   ;;  %vm1783_vm2 = vcmask 64512   ;;  %vm2023_vm3 = vcmask 1043456  }
 0x2b9   : > { %3170 = vmatprep.mubr.msk.bf16.mxu0 %vm4409_vm0, %v4408_v0  ;;  %3178 = vmatprep.mubr.msk.bf16.mxu1 %vm4409_vm0, %v4408_v0  ;;  %v5160_v5 = vld [vmem:[%s847_s14] sm:$0xff]  ;;  %v3619_v9 = vld [vmem:[#allocation8 + $0x28] sm:$0xff]   ;;  %v3632_v24 = vld [vmem:[#allocation14 + $0x18] sm:$0xff]   ;;  %vm2581_vm4 = vcmask 523264   ;;  %s5524_s29 = sld [smem:[#allocation48_spill]]  ;;  %s1005_s0 = scalar_lea.vmem [#allocation35], %s5099_s7 }
 0x2ba   : > { %3167 = vmatpush3.bf16.msra.mxu0 %v3613_v1  ;;  %3175 = vmatpush3.bf16.msra.mxu1 %v3614_v2  ;;  %v1010_v6 = vpack.c.bf16 %v5160_v5, %v5160_v5  ;;  %v3618_v8 = vld [vmem:[#allocation8 + $0x30] sm:$0xff]   ;;  %v3620_v10 = vld [vmem:[#allocation8 + $0x38] sm:$0xff]   ;;  %v3621_v11 = vld [vmem:[#allocation11] sm:$0xff]   ;;  %s2671_s28 = sshll.u32 %s1005_s0, 4  ;;  %s5525_s3 = sld [smem:[#allocation76_spill]]  ;;  %s5323_s28 = int_to_ptr.vmem [resolvable:$true] %s2671_s28 }
 0x2bb   : > { %3168 = vmatprep.subr.bf16.mxu0 %v4408_v0  ;;  %3176 = vmatprep.subr.bf16.mxu1 %v4408_v0  ;;  %v3622_v12 = vld [vmem:[#allocation11 + $0x10] sm:$0xff]   ;;  %v3623_v13 = vld [vmem:[#allocation11 + $0x8] sm:$0xff]   ;;  %v3624_v14 = vld [vmem:[#allocation11 + $0x18] sm:$0xff]   ;;  %s2657_s5 = scalar_lea.sflag [#allocation4], %s5096_s12  ;;  %s4259_s15 = scalar_lea.vmem %s5323_s28, 128 }
 0x2bc   : > { %v1008_v15 = vld [vmem:[%s856_s16] sm:$0xff]  ;;  %v3626_v18 = vld [vmem:[#allocation11 + $0x30] sm:$0xff]   ;;  %p4260_p7 = scmp.ne.s32.totalorder %s5323_s28, %s4259_s15  ;;  %p5527_p6 = scmp.ne.s32.totalorder %s5477_s30, 0 }
 0x2bd   : > { %v3625_v16 = vld [vmem:[#allocation11 + $0x20] sm:$0xff]   ;;  %v1011_v17 = vpack.c.bf16 %v1008_v15, %v1008_v15  ;;  %v3627_v19 = vld [vmem:[#allocation11 + $0x28] sm:$0xff]   ;;  %v3628_v20 = vld [vmem:[#allocation11 + $0x38] sm:$0xff]   ;;  %s4410_s4 = smov [#allocation35]  }
 0x2be   : > { %3169 = vmatpush3.bf16.msra.mxu0 %v3615_v3  ;;  %3177 = vmatpush3.bf16.msra.mxu1 %v3616_v4  ;;  %v3629_v21 = vld [vmem:[#allocation14] sm:$0xff]   ;;  %v3630_v22 = vld [vmem:[#allocation14 + $0x10] sm:$0xff]   ;;  %v3631_v23 = vld [vmem:[#allocation14 + $0x8] sm:$0xff]   ;;  %p4261_p3 = pnand %p4260_p7, %p5527_p6  ;;  %s4263_s7 = sshll.u32 %s4410_s4, 4  ;;  %s4264_s7 = int_to_ptr.vmem [resolvable:$false] %s4263_s7 }
 0x2bf   : > { %3182 = vmatprep.subr.bf16.mxu0 %v4408_v0  ;;  %3190 = vmatprep.subr.bf16.mxu1 %v4408_v0  ;;  %v3633_v25 = vld [vmem:[#allocation14 + $0x20] sm:$0xff]   ;;  %v3634_v26 = vld [vmem:[#allocation14 + $0x30] sm:$0xff]   ;;  %v3635_v27 = vld [vmem:[#allocation14 + $0x28] sm:$0xff]   ;;  %s3095_s22 = sshll.u32 %s5524_s29, 7  ;;  %s4265_s17 = scalar_lea.vmem %s4264_s7, 256 }
 0x2c0   : > { %v3636_v28 = vld [vmem:[#allocation14 + $0x38] sm:$0xff]   ;;  %s5526_s9 = smov %s5525_s3  ;;  %s5321_s27 = scalar_lea.hbm %s5525_s3, %s3095_s22 }
 0x2c1   : > { %3171 = vmatmul.mubr.msk.bf16.vlgmr.msra.gmra.mrb[0].mxu0 %vm1068_vm1, %v1010_v6  ;;  %3179 = vmatmul.mubr.msk.bf16.vlgmr.msra.gmra.mrb[0].mxu1 %vm1068_vm1, %v1010_v6  ;;  %v3033_v45 = vld [vmem:[#allocation13] ss:$0 sm:$0xff]  ;;  %v3034_v46 = vld [vmem:[#allocation13 + $0x1] ss:$0 sm:$0xff]  ;;  %v3017_v57 = vld [vmem:[#allocation10] ss:$0 sm:$0xff]  ;;  %p4262_p8 = pneg %p4261_p3  ;;  %p4266_p2 = scmp.lt.s32.totalorder %s5323_s28, %s4264_s7 }
 0x2c2   : > { %3183 = vmatpush3.bf16.msra.mxu0 %v3617_v7  ;;  %3191 = vmatpush3.bf16.msra.mxu1 %v3618_v8  ;;  %v3018_v60 = vld [vmem:[#allocation10 + $0x1] ss:$0 sm:$0xff]  ;;  %v3035_v63 = vld [vmem:[#allocation13 + $0x2] ss:$0 sm:$0xff]  ;;  %v3036_v2 = vld [vmem:[#allocation13 + $0x3] ss:$0 sm:$0xff]  ;;  %p4267_p1 = scmp.lt.s32.totalorder %s4265_s17, %s4259_s15 }
 0x2c3   : > { %3184 = vmatprep.subr.bf16.mxu0 %v4408_v0  ;;  %3192 = vmatprep.subr.bf16.mxu1 %v4408_v0 }
 0x2c4   : > { %3186 = vmatprep.mubr.msk.bf16.mxu0 %vm4409_vm0, %v4408_v0  ;;  %3194 = vmatprep.mubr.msk.bf16.mxu1 %vm4409_vm0, %v4408_v0  ;;  %p4268_p9 = por %p4267_p1, %p4266_p2 }
 0x2c6   : > { %3185 = vmatpush3.bf16.msra.mxu0 %v3619_v9  ;;  %3193 = vmatpush3.bf16.msra.mxu1 %v3620_v10  ;;  %p4269_p10 = pnand %p4268_p9, %p4262_p8 }
 0x2c7   : > { %3198 = vmatprep.subr.bf16.mxu0 %v4408_v0  ;;  %3206 = vmatprep.subr.bf16.mxu1 %v4408_v0 }
 0x2c9   : > { %3187 = vmatmul.mubr.msk.bf16.vlgmr.msra.gmra.mrb[4].mxu0 %vm1068_vm1, %v1010_v6  ;;  %3195 = vmatmul.mubr.msk.bf16.vlgmr.msra.gmra.mrb[4].mxu1 %vm1068_vm1, %v1010_v6 }
 0x2ca   : > { %3199 = vmatpush3.bf16.msra.mxu0 %v3621_v11  ;;  %3207 = vmatpush3.bf16.msra.mxu1 %v3622_v12 }
 0x2cb   : > { %3200 = vmatprep.subr.bf16.mxu0 %v4408_v0  ;;  %3208 = vmatprep.subr.bf16.mxu1 %v4408_v0 }
 0x2cc   : > { %3202 = vmatprep.mubr.msk.bf16.mxu0 %vm4409_vm0, %v4408_v0  ;;  %3210 = vmatprep.mubr.msk.bf16.mxu1 %vm4409_vm0, %v4408_v0 }
 0x2ce   : > { %3201 = vmatpush3.bf16.msra.mxu0 %v3623_v13  ;;  %3209 = vmatpush3.bf16.msra.mxu1 %v3624_v14 }
 0x2cf   : > { %3214 = vmatprep.subr.bf16.mxu0 %v4408_v0  ;;  %3222 = vmatprep.subr.bf16.mxu1 %v4408_v0 }
 0x2d1   : > { %3203 = vmatmul.mubr.msk.bf16.vlgmr.msra.gmra.mrb[8].mxu0 %vm1068_vm1, %v1011_v17  ;;  %3211 = vmatmul.mubr.msk.bf16.vlgmr.msra.gmra.mrb[8].mxu1 %vm1068_vm1, %v1011_v17 }
 0x2d2   : > { %3215 = vmatpush3.bf16.msra.mxu0 %v3625_v16  ;;  %3223 = vmatpush3.bf16.msra.mxu1 %v3626_v18 }
 0x2d3   : > { %3216 = vmatprep.subr.bf16.mxu0 %v4408_v0  ;;  %3224 = vmatprep.subr.bf16.mxu1 %v4408_v0 }
 0x2d4   : > { %3218 = vmatprep.mubr.msk.bf16.mxu0 %vm4409_vm0, %v4408_v0  ;;  %3226 = vmatprep.mubr.msk.bf16.mxu1 %vm4409_vm0, %v4408_v0 }
 0x2d6   : > { %3217 = vmatpush3.bf16.msra.mxu0 %v3627_v19  ;;  %3225 = vmatpush3.bf16.msra.mxu1 %v3628_v20  ;;  %v3020_v20 = vld [vmem:[#allocation10 + $0x3] ss:$0 sm:$0xff] }
 0x2d7   : > { %3230 = vmatprep.subr.bf16.mxu0 %v4408_v0  ;;  %3238 = vmatprep.subr.bf16.mxu1 %v4408_v0 }
 0x2d9   : > { %3219 = vmatmul.mubr.msk.bf16.vlgmr.msra.gmra.mrb[12].mxu0 %vm1068_vm1, %v1011_v17  ;;  %3227 = vmatmul.mubr.msk.bf16.vlgmr.msra.gmra.mrb[12].mxu1 %vm1068_vm1, %v1011_v17 }
 0x2da   : > { %3231 = vmatpush3.bf16.msra.mxu0 %v3629_v21  ;;  %3234 = vmatprep.mubr.msk.bf16.mxu0 %vm4409_vm0, %v4408_v0 }
 0x2db   : > { %3232 = vmatprep.subr.bf16.mxu0 %v4408_v0  ;;  %3242 = vmatprep.mubr.msk.bf16.mxu1 %vm4409_vm0, %v4408_v0 }
 0x2dc   : > { %3239 = vmatpush3.bf16.msra.mxu1 %v3630_v22 }
 0x2dd   : > { %3240 = vmatprep.subr.bf16.mxu1 %v4408_v0 }
 0x2de   : > { %3233 = vmatpush3.bf16.msra.mxu0 %v3631_v23 }
 0x2df   : > { %3246 = vmatprep.subr.bf16.mxu0 %v4408_v0 }
 0x2e0   : > { %3241 = vmatpush3.bf16.msra.mxu1 %v3632_v24 }
 0x2e1   : > { %3235 = vmatmul.mubr.msk.bf16.vlgmr.msra.gmra.mrb[16].mxu0 %vm1068_vm1, %v1011_v17  ;;  %3254 = vmatprep.subr.bf16.mxu1 %v4408_v0 }
 0x2e2   : > { %3250 = vmatprep.mubr.msk.bf16.mxu0 %vm4409_vm0, %v4408_v0  ;;  %3247 = vmatpush3.bf16.msra.mxu0 %v3633_v25 }
 0x2e3   : > { %3243 = vmatmul.mubr.msk.bf16.vlgmr.msra.gmra.mrb[16].mxu1 %vm1068_vm1, %v1011_v17  ;;  %3248 = vmatprep.subr.bf16.mxu0 %v4408_v0 }
 0x2e4   : > { %3255 = vmatpush3.bf16.msra.mxu1 %v3634_v26  ;;  %3258 = vmatprep.mubr.msk.bf16.mxu1 %vm4409_vm0, %v4408_v0 }
 0x2e5   : > { %3256 = vmatprep.subr.bf16.mxu1 %v4408_v0 }
 0x2e6   : > { %3249 = vmatpush3.bf16.msra.mxu0 %v3635_v27  ;;  %v3049_v27 = vld [vmem:[#allocation16] ss:$0 sm:$0xff] }
 0x2e7   : > { %3262 = vmatprep.subr.bf16.mxu0 %v4408_v0 }
 0x2e8   : > { %3257 = vmatpush3.bf16.msra.mxu1 %v3636_v28 }
 0x2e9   : > { %3268 = vmatprep.subr.bf16.mxu1 %v4408_v0  ;;  %3251 = vmatmul.mubr.msk.bf16.vlgmr.msra.gmra.mrb[20].mxu0 %vm1068_vm1, %v1011_v17 }
 0x2ea   : > { %3264 = vmatprep.mubr.msk.bf16.mxu0 %vm4409_vm0, %v4408_v0 }
 0x2eb   : > { %3259 = vmatmul.mubr.msk.bf16.vlgmr.msra.gmra.mrb[20].mxu1 %vm1068_vm1, %v1011_v17  ;;  %v3019_v17 = vld [vmem:[#allocation10 + $0x2] ss:$0 sm:$0xff] }
 0x2ec   : > { %3270 = vmatprep.mubr.msk.bf16.mxu1 %vm4409_vm0, %v4408_v0 }
 0x394   : > { %v1106_v29 = vpop.f32.mrb[0].mxu0  ;;  %v1158_v31 = vpop.f32.mrb[0].mxu1 }
 0x395   : > { %v3172_v30 = vpop.f32.mrb[1].mxu0  ;;  %v3180_v33 = vpop.f32.mrb[1].mxu1  ;;  %v1107_v1 = vadd.f32 %v3017_v57, %v1106_v29  ;;  %v1159_v3 = vadd.f32 %v3018_v60, %v1158_v31  ;;  %v3050_v29 = vld [vmem:[#allocation16 + $0x1] ss:$0 sm:$0xff] }
 0x396   : > { %v1109_v32 = vpop.f32.mrb[2].mxu0  ;;  %v1161_v35 = vpop.f32.mrb[2].mxu1 }
 0x397   : > { %v3173_v34 = vpop.f32.mrb[3].mxu0  ;;  %v3181_v36 = vpop.f32.mrb[3].mxu1  ;;  %v1775_v12 = vpack.c.bf16 %v1107_v1, %v1107_v1  ;;  %v1776_v16 = vpack.c.bf16 %v1159_v3, %v1159_v3 }
 0x39c   : > { %v1210_v37 = vpop.f32.mrb[4].mxu0  ;;  %v1262_v39 = vpop.f32.mrb[4].mxu1 }
 0x39d   : > { %v3188_v38 = vpop.f32.mrb[5].mxu0  ;;  %v3196_v41 = vpop.f32.mrb[5].mxu1  ;;  %v1211_v23 = vadd.f32 %v3019_v17, %v1210_v37  ;;  %v1263_v24 = vadd.f32 %v3020_v20, %v1262_v39 }
 0x39e   : > { %v1213_v40 = vpop.f32.mrb[6].mxu0  ;;  %v1265_v43 = vpop.f32.mrb[6].mxu1 }
 0x39f   : > { %v3189_v42 = vpop.f32.mrb[7].mxu0  ;;  %v3197_v44 = vpop.f32.mrb[7].mxu1  ;;  %v1777_v25 = vpack.c.bf16 %v1211_v23, %v1211_v23  ;;  %v1778_v26 = vpack.c.bf16 %v1263_v24, %v1263_v24 }
 0x3a4   : > { %v1361_v47 = vpop.f32.mrb[8].mxu0  ;;  %v1413_v49 = vpop.f32.mrb[8].mxu1 }
 0x3a5   : > { %v1362_v48 = vadd.f32 %v3033_v45, %v1361_v47  ;;  %v3204_v50 = vpop.f32.mrb[9].mxu0  ;;  %v1414_v51 = vadd.f32 %v3034_v46, %v1413_v49  ;;  %v3212_v53 = vpop.f32.mrb[9].mxu1 }
 0x3a6   : > { %v1364_v52 = vpop.f32.mrb[10].mxu0  ;;  %v1416_v56 = vpop.f32.mrb[10].mxu1 }
 0x3a7   : > { %v1779_v54 = vpack.c.bf16 %v1362_v48, %v1362_v48  ;;  %v3205_v55 = vpop.f32.mrb[11].mxu0  ;;  %v1780_v58 = vpack.c.bf16 %v1414_v51, %v1414_v51  ;;  %v3213_v59 = vpop.f32.mrb[11].mxu1 }
 0x3a9   : > { %v1788_v61 = vsel %vm1783_vm2, %v1779_v54, 0  ;;  %v1834_v62 = vsel %vm1783_vm2, %v1780_v58, 0 }
 0x3aa   : > { %3263 = vmatpush3.bf16.xpose.msra.mxu0 %v1788_v61  ;;  %3269 = vmatpush3.bf16.xpose.msra.mxu1 %v1834_v62 }
 0x3ab   : > { %3274 = vmatprep.subr.bf16.mxu0 %v4408_v0  ;;  %3280 = vmatprep.subr.bf16.mxu1 %v4408_v0 }
 0x3ac   : > { %v1465_v4 = vpop.f32.mrb[12].mxu0  ;;  %v1517_v7 = vpop.f32.mrb[12].mxu1 }
 0x3ad   : > { %v1466_v6 = vadd.f32 %v3035_v63, %v1465_v4  ;;  %v3220_v8 = vpop.f32.mrb[13].mxu0  ;;  %v1518_v9 = vadd.f32 %v3036_v2, %v1517_v7  ;;  %v3228_v11 = vpop.f32.mrb[13].mxu1 }
 0x3ae   : > { %v1468_v10 = vpop.f32.mrb[14].mxu0  ;;  %v1520_v15 = vpop.f32.mrb[14].mxu1 }
 0x3af   : > { %v1781_v13 = vpack.c.bf16 %v1466_v6, %v1466_v6  ;;  %v3221_v14 = vpop.f32.mrb[15].mxu0  ;;  %v1782_v18 = vpack.c.bf16 %v1518_v9, %v1518_v9  ;;  %v3229_v19 = vpop.f32.mrb[15].mxu1 }
 0x3b1   : > { %v1880_v21 = vsel %vm1783_vm2, %v1781_v13, 0  ;;  %3265 = vmatmul.mubr.msk.bf16.vlgmr.msra.gmra.mrb[24].mxu0 %vm1783_vm2, %v1775_v12  ;;  %v1926_v22 = vsel %vm1783_vm2, %v1782_v18, 0  ;;  %3271 = vmatmul.mubr.msk.bf16.vlgmr.msra.gmra.mrb[24].mxu1 %vm1783_vm2, %v1776_v16 }
 0x3b2   : > { %3275 = vmatpush3.bf16.xpose.msra.mxu0 %v1880_v21  ;;  %3281 = vmatpush3.bf16.xpose.msra.mxu1 %v1926_v22 }
 0x3b3   : > { %3276 = vmatprep.mubr.msk.bf16.mxu0 %vm4409_vm0, %v4408_v0  ;;  %3282 = vmatprep.mubr.msk.bf16.mxu1 %vm4409_vm0, %v4408_v0 }
 0x3b4   : > { %3286 = vmatprep.subr.bf16.mxu0 %v4408_v0  ;;  %3292 = vmatprep.subr.bf16.mxu1 %v4408_v0  ;;  %v1613_v28 = vpop.f32.mrb[16].mxu0 }
 0x3b5   : > { %v1614_v30 = vadd.f32 %v3049_v27, %v1613_v28  ;;  %v3236_v31 = vpop.f32.mrb[17].mxu0 }
 0x3b6   : > { %v1616_v32 = vpop.f32.mrb[18].mxu0  ;;  %v1665_v33 = vpop.f32.mrb[16].mxu1  ;;  %v3051_v31 = vld [vmem:[#allocation16 + $0x2] ss:$0 sm:$0xff] }
 0x3b7   : > { %v2016_v34 = vpack.c.bf16 %v1614_v30, %v1614_v30  ;;  %v3237_v35 = vpop.f32.mrb[19].mxu0  ;;  %v1666_v36 = vadd.f32 %v3050_v29, %v1665_v33  ;;  %v3244_v37 = vpop.f32.mrb[17].mxu1 }
 0x3b8   : > { %v1668_v38 = vpop.f32.mrb[18].mxu1 }
 0x3b9   : > { %3277 = vmatmul.mubr.msk.bf16.vlgmr.msra.gmra.mrb[28].mxu0 %vm1783_vm2, %v1777_v25  ;;  %3283 = vmatmul.mubr.msk.bf16.vlgmr.msra.gmra.mrb[28].mxu1 %vm1783_vm2, %v1778_v26  ;;  %v2025_v39 = vsel %vm2023_vm3, %v2016_v34, 0  ;;  %v2017_v40 = vpack.c.bf16 %v1666_v36, %v1666_v36  ;;  %v3245_v41 = vpop.f32.mrb[19].mxu1  ;;  %v3052_v34 = vld [vmem:[#allocation16 + $0x3] ss:$0 sm:$0xff] }
 0x3ba   : > { %3288 = vmatprep.mubr.msk.bf16.mxu0 %vm4409_vm0, %v4408_v0  ;;  %3294 = vmatprep.mubr.msk.bf16.mxu1 %vm4409_vm0, %v4408_v0 }
 0x3bb   : > { %3287 = vmatpush3.bf16.msra.mxu0 %v2025_v39  ;;  %v2071_v42 = vsel %vm2023_vm3, %v2017_v40, 0 }
 0x3bc   : > { %3298 = vmatprep.subr.bf16.mxu0 %v4408_v0  ;;  %3293 = vmatpush3.bf16.msra.mxu1 %v2071_v42  ;;  %v5248_v43 = vpop.f32.mrb[20].mxu0 }
 0x3bd   : > { %3304 = vmatprep.subr.bf16.mxu1 %v4408_v0  ;;  %v3252_v45 = vpop.f32.mrb[21].mxu0  ;;  %v1718_v32 = vadd.f32 %v3051_v31, %v5248_v43 }
 0x3be   : > { %v5250_v44 = vpop.f32.mrb[20].mxu1  ;;  %v1720_v47 = vpop.f32.mrb[22].mxu0 }
 0x3bf   : > { %v3260_v46 = vpop.f32.mrb[21].mxu1  ;;  %v3253_v49 = vpop.f32.mrb[23].mxu0  ;;  %v2018_v36 = vpack.c.bf16 %v1718_v32, %v1718_v32  ;;  %v1770_v37 = vadd.f32 %v3052_v34, %v5250_v44  ;;  %v2209_v44 = vld [vmem:[#allocation17] sm:$0xf] }
 0x3c0   : > { %v1772_v48 = vpop.f32.mrb[22].mxu1 }
 0x3c1   : > { %v3261_v50 = vpop.f32.mrb[23].mxu1  ;;  %v2117_v42 = vsel %vm2023_vm3, %v2018_v36, 0  ;;  %v2019_v45 = vpack.c.bf16 %v1770_v37, %v1770_v37 }
 0x3c3   : > { %v2163_v48 = vsel %vm2023_vm3, %v2019_v45, 0 }
 0x484   : > { %v1824_v51 = vpop.f32.mrb[24].mxu0  ;;  %v1870_v52 = vpop.f32.mrb[24].mxu1 }
 0x485   : > { %v3266_v53 = vpop.f32.mrb[25].mxu0  ;;  %v1968_v54 = vsel %vm1783_vm2, %v1824_v51, -inf  ;;  %v3272_v55 = vpop.f32.mrb[25].mxu1  ;;  %v1971_v60 = vsel %vm1783_vm2, %v1870_v52, -inf }
 0x486   : > { %1969 = vmax.xlane.f32.xlu0 %v1968_v54  ;;  %v1827_v56 = vpop.f32.mrb[26].mxu0  ;;  %v1873_v57 = vpop.f32.mrb[26].mxu1  ;;  %v2210_v55 = vld [vmem:[#allocation17 + $0x4] sm:$0xf] }
 0x487   : > { %v3267_v58 = vpop.f32.mrb[27].mxu0  ;;  %v3273_v59 = vpop.f32.mrb[27].mxu1  ;;  %v2263_v56 = vsel %vm2023_vm3, %v2210_v55, 0  ;;  %v2211_v57 = vld [vmem:[#allocation17 + $0x8] sm:$0xf] }
 0x488   : > { %v3078_v55 = vld [vmem:[#allocation20] ss:$0 sm:$0xff] }
 0x48a   : > { %1972 = vmax.xlane.f32.xlu0 %v1971_v60 }
 0x48c   : > { %v1916_v61 = vpop.f32.mrb[28].mxu0  ;;  %v1962_v62 = vpop.f32.mrb[28].mxu1 }
 0x48d   : > { %v3278_v63 = vpop.f32.mrb[29].mxu0  ;;  %v1974_v1 = vsel %vm1783_vm2, %v1916_v61, -inf  ;;  %v3284_v2 = vpop.f32.mrb[29].mxu1  ;;  %v1977_v8 = vsel %vm1783_vm2, %v1962_v62, -inf }
 0x48e   : > { %1975 = vmax.xlane.f32.xlu1 %v1974_v1  ;;  %v1919_v3 = vpop.f32.mrb[30].mxu0  ;;  %v1965_v4 = vpop.f32.mrb[30].mxu1  ;;  %v2212_v63 = vld [vmem:[#allocation17 + $0xc] sm:$0xf] }
 0x48f   : > { %v3279_v6 = vpop.f32.mrb[31].mxu0  ;;  %v3285_v7 = vpop.f32.mrb[31].mxu1 }
 0x490   : > { %v2355_v6 = vsel %vm2023_vm3, %v2212_v63, 0 }
 0x492   : > { %1978 = vmax.xlane.f32.xlu1 %v1977_v8 }
 0x513   : > { %v1970_v9 = vpop.xlane.xlu0 %1969 }
 0x514   : > { %v1980_v10 = vsub.f32 %v1824_v51, %v1970_v9  ;;  %v2217_v51 = vsel %vm2023_vm3, %v2209_v44, 0 }
 0x516   : > { %v1984_v11 = vmul.f32 1.442695, %v1980_v10 }
 0x517   : > { %v1973_v12 = vpop.xlane.xlu0 %1972 }
 0x518   : > { %3643 = vpow2.f32 %v1984_v11  ;;  %v1981_v13 = vsub.f32 %v1870_v52, %v1973_v12 }
 0x51a   : > { %v1986_v14 = vmul.f32 1.442695, %v1981_v13 }
 0x51b   : > { %v1976_v15 = vpop.xlane.xlu1 %1975 }
 0x51c   : > { %3645 = vpow2.f32 %v1986_v14  ;;  %v1982_v16 = vsub.f32 %v1916_v61, %v1976_v15  ;;  %v2309_v61 = vsel %vm2023_vm3, %v2211_v57, 0  ;;  %v3079_v57 = vld [vmem:[#allocation22] ss:$0 sm:$0xff] }
 0x51e   : > { %v1988_v17 = vmul.f32 1.442695, %v1982_v16 }
 0x51f   : > { %v1979_v18 = vpop.xlane.xlu1 %1978 }
 0x520   : > { %3647 = vpow2.f32 %v1988_v17  ;;  %v1983_v19 = vsub.f32 %v1962_v62, %v1979_v18 }
 0x522   : > { %v3644_v20 = vpop.eup %3643  ;;  %v1990_v21 = vmul.f32 1.442695, %v1983_v19 }
 0x523   : > { %v1992_v22 = vsel %vm1783_vm2, %v3644_v20, 0.0 }
 0x524   : > { %3649 = vpow2.f32 %v1990_v21  ;;  %1993 = vadd.xlane.f32.xlu0 %v1992_v22 }
 0x526   : > { %v3646_v23 = vpop.eup %3645 }
 0x527   : > { %v1995_v24 = vsel %vm1783_vm2, %v3646_v23, 0.0 }
 0x528   : > { %1996 = vadd.xlane.f32.xlu1 %v1995_v24 }
 0x52a   : > { %v3648_v25 = vpop.eup %3647 }
 0x52b   : > { %v1998_v26 = vsel %vm1783_vm2, %v3648_v25, 0.0 }
 0x52c   : > { %1999 = vadd.xlane.f32.xlu0 %v1998_v26 }
 0x52e   : > { %v3650_v27 = vpop.eup %3649 }
 0x52f   : > { %v2001_v28 = vsel %vm1783_vm2, %v3650_v27, 0.0 }
 0x530   : > { %2002 = vadd.xlane.f32.xlu1 %v2001_v28 }
 0x5b1   : > { %v1994_v29 = vpop.xlane.xlu0 %1993 }
 0x5b2   : > { %3651 = vrcp.f32 %v1994_v29 }
 0x5b5   : > { %v1997_v30 = vpop.xlane.xlu1 %1996 }
 0x5b6   : > { %3653 = vrcp.f32 %v1997_v30 }
 0x5b9   : > { %v2000_v33 = vpop.xlane.xlu0 %1999 }
 0x5ba   : > { %3655 = vrcp.f32 %v2000_v33 }
 0x5bc   : > { %v3652_v35 = vpop.eup %3651 }
 0x5bd   : > { %v2008_v38 = vmul.f32 %v3652_v35, %v3644_v20  ;;  %v2003_v39 = vpop.xlane.xlu1 %2002 }
 0x5be   : > { %3657 = vrcp.f32 %v2003_v39 }
 0x5bf   : > { %v2012_v40 = vpack.c.bf16 %v2008_v38, %v2008_v38  ;;  %v3077_v38 = vld [vmem:[#allocation19] ss:$0 sm:$0xff] }
 0x5c0   : > { %v3654_v41 = vpop.eup %3653 }
 0x5c1   : > { %v2009_v46 = vmul.f32 %v3654_v41, %v3646_v23  ;;  %3289 = vmatmul.mubr.msk.bf16.vlgmr.msra.gmra.mrb[32].mxu0 %vm1783_vm2, %v2012_v40 }
 0x5c2   : > { %3299 = vmatpush3.bf16.msra.mxu0 %v2117_v42  ;;  %3300 = vmatprep.mubr.msk.bf16.mxu0 %vm4409_vm0, %v4408_v0 }
 0x5c3   : > { %v2013_v43 = vpack.c.bf16 %v2009_v46, %v2009_v46  ;;  %3310 = vmatprep.subr.bf16.mxu0 %v4408_v0 }
 0x5c4   : > { %v3656_v47 = vpop.eup %3655 }
 0x5c5   : > { %v2010_v49 = vmul.f32 %v3656_v47, %v3648_v25  ;;  %3295 = vmatmul.mubr.msk.bf16.vlgmr.msra.gmra.mrb[32].mxu1 %vm1783_vm2, %v2013_v43 }
 0x5c6   : > { %3305 = vmatpush3.bf16.msra.mxu1 %v2163_v48  ;;  %3306 = vmatprep.mubr.msk.bf16.mxu1 %vm4409_vm0, %v4408_v0 }
 0x5c7   : > { %v2014_v50 = vpack.c.bf16 %v2010_v49, %v2010_v49  ;;  %3316 = vmatprep.subr.bf16.mxu1 %v4408_v0 }
 0x5c8   : > { %v3658_v52 = vpop.eup %3657 }
 0x5c9   : > { %v2011_v53 = vmul.f32 %v3658_v52, %v3650_v27  ;;  %3301 = vmatmul.mubr.msk.bf16.vlgmr.msra.gmra.mrb[36].mxu0 %vm1783_vm2, %v2014_v50 }
 0x5ca   : > { %3311 = vmatpush3.bf16.msra.mxu0 %v2217_v51  ;;  %3312 = vmatprep.mubr.msk.bf16.mxu0 %vm4409_vm0, %v4408_v0 }
 0x5cb   : > { %v2015_v54 = vpack.c.bf16 %v2011_v53, %v2011_v53  ;;  %3322 = vmatprep.subr.bf16.mxu0 %v4408_v0 }
 0x5cd   : > { %3307 = vmatmul.mubr.msk.bf16.vlgmr.msra.gmra.mrb[36].mxu1 %vm1783_vm2, %v2015_v54 }
 0x5ce   : > { %3318 = vmatprep.mubr.msk.bf16.mxu1 %vm4409_vm0, %v4408_v0  ;;  %3317 = vmatpush3.bf16.msra.mxu1 %v2263_v56 }
 0x5cf   : > { %3328 = vmatprep.subr.bf16.mxu1 %v4408_v0 }
 0x694   : > { %v2061_v58 = vpop.f32.mrb[32].mxu0 }
 0x695   : > { %v2205_v59 = vpack.c.bf16 %v2061_v58, %v2061_v58  ;;  %v3290_v60 = vpop.f32.mrb[33].mxu0  ;;  %v1009_v58 = vld [vmem:[%s865_s1] sm:$0xff] }
 0x696   : > { %v2064_v62 = vpop.f32.mrb[34].mxu0 }
 0x697   : > { %v3291_v1 = vpop.f32.mrb[35].mxu0  ;;  %3313 = vmatmul.mubr.msk.bf16.vlgmr.msra.gmra.mrb[40].mxu0 %vm1783_vm2, %v2205_v59 }
 0x698   : > { %v2107_v2 = vpop.f32.mrb[32].mxu1  ;;  %3323 = vmatpush3.bf16.msra.mxu0 %v2309_v61  ;;  %3324 = vmatprep.mubr.msk.bf16.mxu0 %vm4409_vm0, %v4408_v0 }
 0x699   : > { %v2206_v3 = vpack.c.bf16 %v2107_v2, %v2107_v2  ;;  %v3296_v4 = vpop.f32.mrb[33].mxu1  ;;  %3334 = vmatprep.subr.bf16.mxu0 %v4408_v0 }
 0x69a   : > { %v2110_v7 = vpop.f32.mrb[34].mxu1  ;;  %v3637_v4 = vld [vmem:[#allocation26] sm:$0xff]  }
 0x69b   : > { %v3297_v8 = vpop.f32.mrb[35].mxu1  ;;  %3319 = vmatmul.mubr.msk.bf16.vlgmr.msra.gmra.mrb[40].mxu1 %vm1783_vm2, %v2206_v3  ;;  %v3639_v7 = vld [vmem:[#allocation29] sm:$0xff]  }
 0x69c   : > { %v2153_v9 = vpop.f32.mrb[36].mxu0  ;;  %3329 = vmatpush3.bf16.msra.mxu1 %v2355_v6  ;;  %3330 = vmatprep.mubr.msk.bf16.mxu1 %vm4409_vm0, %v4408_v0  ;;  %v3638_v6 = vld [vmem:[#allocation26 + $0x8] sm:$0xff]   ;;  %v3640_v8 = vld [vmem:[#allocation29 + $0x8] sm:$0xff]  }
 0x69d   : > { %v2207_v10 = vpack.c.bf16 %v2153_v9, %v2153_v9  ;;  %v3302_v11 = vpop.f32.mrb[37].mxu0  ;;  %3342 = vmatprep.subr.bf16.mxu1 %v4408_v0 }
 0x69e   : > { %v2156_v12 = vpop.f32.mrb[38].mxu0 }
 0x69f   : > { %v3303_v13 = vpop.f32.mrb[39].mxu0  ;;  %3325 = vmatmul.mubr.msk.bf16.vlgmr.msra.gmra.mrb[44].mxu0 %vm1783_vm2, %v2207_v10 }
 0x6a0   : > { %v2199_v14 = vpop.f32.mrb[36].mxu1  ;;  %3338 = vmatprep.mubr.msk.bf16.mxu0 %vm4409_vm0, %v4408_v0  ;;  %3335 = vmatpush3.bf16.msra.mxu0 %v3637_v4  ;;  %v3080_v13 = vld [vmem:[#allocation23] ss:$0 sm:$0xff] }
 0x6a1   : > { %v2208_v15 = vpack.c.bf16 %v2199_v14, %v2199_v14  ;;  %v3308_v16 = vpop.f32.mrb[37].mxu1  ;;  %3336 = vmatprep.subr.bf16.mxu0 %v4408_v0 }
 0x6a2   : > { %v2202_v17 = vpop.f32.mrb[38].mxu1 }
 0x6a3   : > { %v3309_v18 = vpop.f32.mrb[39].mxu1  ;;  %3331 = vmatmul.mubr.msk.bf16.vlgmr.msra.gmra.mrb[44].mxu1 %vm1783_vm2, %v2208_v15  ;;  %v3081_v15 = vld [vmem:[#allocation25] ss:$0 sm:$0xff] }
 0x6a4   : > { %3350 = vmatprep.mubr.msk.bf16.mxu1 %vm4409_vm0, %v4408_v0  ;;  %3337 = vmatpush3.bf16.msra.mxu0 %v3638_v6 }
 0x6a5   : > { %3343 = vmatpush3.bf16.msra.mxu1 %v3639_v7 }
 0x6a6   : > { %3344 = vmatprep.subr.bf16.mxu1 %v4408_v0 }
 0x6a9   : > { %3345 = vmatpush3.bf16.msra.mxu1 %v3640_v8 }
 0x6aa   : > { %3346 = vmatprep.subr.bf16.mxu1 %v4408_v0 }
 0x76a   : > { %v2253_v19 = vpop.f32.mrb[40].mxu0 }
 0x76b   : > { %v3314_v20 = vpop.f32.mrb[41].mxu0  ;;  %v2397_v24 = vsel %vm1068_vm1, %v2253_v19, 0.0  ;;  %v3641_v19 = vld [vmem:[#allocation29 + $0x10] sm:$0xff]  }
 0x76c   : > { %v2256_v21 = vpop.f32.mrb[42].mxu0  ;;  %3347 = vmatpush3.bf16.msra.mxu1 %v3641_v19  ;;  %v3642_v20 = vld [vmem:[#allocation29 + $0x18] sm:$0xff]  }
 0x76d   : > { %v3315_v22 = vpop.f32.mrb[43].mxu0  ;;  %3348 = vmatprep.subr.bf16.mxu1 %v4408_v0  ;;  %v3082_v21 = vld [vmem:[#allocation28] ss:$0 sm:$0xff] }
 0x76e   : > { %v2299_v23 = vpop.f32.mrb[40].mxu1 }
 0x76f   : > { %v2398_v25 = vsel %vm1068_vm1, %v2299_v23, 0.0  ;;  %v3320_v26 = vpop.f32.mrb[41].mxu1 }
 0x770   : > { %v2399_v27 = vadd.f32 %v2398_v25, %v2397_v24  ;;  %v2302_v28 = vpop.f32.mrb[42].mxu1  ;;  %3349 = vmatpush3.bf16.msra.mxu1 %v3642_v20 }
 0x771   : > { %v3321_v29 = vpop.f32.mrb[43].mxu1 }
 0x772   : > { %v2345_v30 = vpop.f32.mrb[44].mxu0  ;;  %v3086_v29 = vld [vmem:[#allocation31] ss:$0 sm:$0xff] }
 0x773   : > { %v2400_v31 = vsel %vm1068_vm1, %v2345_v30, 0.0  ;;  %v3326_v32 = vpop.f32.mrb[45].mxu0 }
 0x774   : > { %v2401_v33 = vadd.f32 %v2400_v31, %v2399_v27  ;;  %v2348_v34 = vpop.f32.mrb[46].mxu0 }
 0x775   : > { %v3327_v35 = vpop.f32.mrb[47].mxu0 }
 0x776   : > { %v2391_v36 = vpop.f32.mrb[44].mxu1 }
 0x777   : > { %v2402_v37 = vsel %vm1068_vm1, %v2391_v36, 0.0  ;;  %v3332_v39 = vpop.f32.mrb[45].mxu1 }
 0x778   : > { %v2403_v40 = vadd.f32 %v2402_v37, %v2401_v33  ;;  %v2394_v41 = vpop.f32.mrb[46].mxu1 }
 0x779   : > { %v3333_v42 = vpop.f32.mrb[47].mxu1 }
 0x77a   : > { %v2411_v45 = vadd.f32 %v3077_v38, %v2403_v40 }
 0x77c   : > { %v2412_v46 = vadd.f32 %v2411_v45, %v5160_v5 }
 0x77e   : > { %v2415_v43 = vsel %vm1068_vm1, %v2412_v46, 0.0 }
 0x77f   : > { %2416 = vadd.xlane.f32.xlu0 %v2415_v43  ;;  %v3092_v43 = vld [vmem:[#allocation32] ss:$0 sm:$0xff] }
 0x80c   : > { %v2417_v47 = vpop.xlane.xlu0 %2416 }
 0x80d   : > { %v2419_v44 = vmul.f32 0.03125, %v2417_v47 }
 0x80f   : > { %v2420_v48 = vsub.f32 %v2412_v46, %v2419_v44  ;;  %v3093_v44 = vld [vmem:[#allocation34] ss:$0 sm:$0xff] }
 0x811   : > { %v2421_v49 = vmul.f32 %v2420_v48, %v2420_v48 }
 0x813   : > { %v2422_v50 = vsel %vm1068_vm1, %v2421_v49, 0.0 }
 0x814   : > { %2423 = vadd.xlane.f32.xlu1 %v2422_v50 }
 0x8a1   : > { %v2424_v51 = vpop.xlane.xlu1 %2423 }
 0x8a2   : > { %v2425_v52 = vmul.f32 0.03125, %v2424_v51 }
 0x8a4   : > { %v2426_v53 = vadd.f32 1e-05, %v2425_v52 }
 0x8a6   : > { %3659 = vrsqrt.f32 %v2426_v53 }
 0x8b0   : > { %v3660_v54 = vpop.eup %3659 }
 0x8b1   : > { %v2428_v56 = vmul.f32 %v3660_v54, %v2420_v48 }
 0x8b3   : > { %v2435_v5 = vmul.f32 %v3078_v55, %v2428_v56 }
 0x8b5   : > { %v2442_v59 = vadd.f32 %v3079_v57, %v2435_v5 }
 0x8b7   : > { %v2443_v60 = vadd.f32 %v2442_v59, %v1009_v58 }
 0x8b9   : > { %v2446_v61 = vsel %vm1068_vm1, %v2443_v60, 0.0 }
 0x8ba   : > { %2447 = vadd.xlane.f32.xlu0 %v2446_v61 }
 0x947   : > { %v2448_v62 = vpop.xlane.xlu0 %2447 }
 0x948   : > { %v2449_v63 = vmul.f32 0.03125, %v2448_v62 }
 0x94a   : > { %v2450_v1 = vsub.f32 %v2443_v60, %v2449_v63 }
 0x94c   : > { %v2451_v2 = vmul.f32 %v2450_v1, %v2450_v1 }
 0x94e   : > { %v2452_v3 = vsel %vm1068_vm1, %v2451_v2, 0.0 }
 0x94f   : > { %2453 = vadd.xlane.f32.xlu1 %v2452_v3 }
 0x9dc   : > { %v2454_v9 = vpop.xlane.xlu1 %2453 }
 0x9dd   : > { %v2455_v10 = vmul.f32 0.03125, %v2454_v9 }
 0x9df   : > { %v2456_v11 = vadd.f32 1e-05, %v2455_v10 }
 0x9e1   : > { %3661 = vrsqrt.f32 %v2456_v11 }
 0x9eb   : > { %v3662_v12 = vpop.eup %3661 }
 0x9ec   : > { %v2458_v14 = vmul.f32 %v3662_v12, %v2450_v1 }
 0x9ee   : > { %v2465_v16 = vmul.f32 %v3080_v13, %v2458_v14 }
 0x9f0   : > { %v2472_v17 = vadd.f32 %v3081_v15, %v2465_v16 }
 0x9f2   : > { %v2473_v18 = vpack.c.bf16 %v2472_v17, %v2472_v17 }
 0x9f4   : > { %3339 = vmatmul.mubr.msk.bf16.vlgmr.msra.gmra.mrb[48].mxu0 %vm1068_vm1, %v2473_v18 }
 0xac7   : > { %v2534_v22 = vpop.f32.mrb[48].mxu0 }
 0xac8   : > { %v2535_v23 = vadd.f32 %v3082_v21, %v2534_v22  ;;  %v3340_v24 = vpop.f32.mrb[49].mxu0 }
 0xac9   : > { %v2537_v25 = vpop.f32.mrb[50].mxu0 }
 0xaca   : > { %v2540_v26 = vmax.f32 %v2535_v23, 0.0  ;;  %v3341_v27 = vpop.f32.mrb[51].mxu0 }
 0xacc   : > { %v2541_v28 = vpack.c.bf16 %v2540_v26, %v2540_v26 }
 0xace   : > { %3351 = vmatmul.mubr.msk.bf16.vlgmr.msra.gmra.mrb[48].mxu1 %vm2581_vm4, %v2541_v28 }
 0xba1   : > { %v2619_v30 = vpop.f32.mrb[48].mxu1 }
 0xba2   : > { %v2620_v31 = vadd.f32 %v3086_v29, %v2619_v30  ;;  %v3352_v32 = vpop.f32.mrb[49].mxu1 }
 0xba3   : > { %v2622_v33 = vpop.f32.mrb[50].mxu1 }
 0xba4   : > { %v3353_v34 = vpop.f32.mrb[51].mxu1  ;;  %v2625_v35 = vadd.f32 %v2620_v31, %v2472_v17 }
 0xba6   : > { %v2628_v0 = vsel %vm1068_vm1, %v2625_v35, 0.0 }
 0xba7   : > { %2629 = vadd.xlane.f32.xlu0 %v2628_v0 }
 0xc34   : > { %v2630_v36 = vpop.xlane.xlu0 %2629 }
 0xc35   : > { %v2631_v37 = vmul.f32 0.03125, %v2630_v36 }
 0xc37   : > { %v2632_v38 = vsub.f32 %v2625_v35, %v2631_v37 }
 0xc39   : > { %v2633_v39 = vmul.f32 %v2632_v38, %v2632_v38 }
 0xc3b   : > { %v2634_v40 = vsel %vm1068_vm1, %v2633_v39, 0.0 }
 0xc3c   : > { %2635 = vadd.xlane.f32.xlu1 %v2634_v40 }
 0xcc9   : > { %v2636_v41 = vpop.xlane.xlu1 %2635 }
 0xcca   : > { %v2637_v42 = vmul.f32 0.03125, %v2636_v41 }
 0xccc   : > { %v2638_v45 = vadd.f32 1e-05, %v2637_v42 }
 0xcce   : > { %3663 = vrsqrt.f32 %v2638_v45 }
 0xcd8   : > { %v3664_v46 = vpop.eup %3663 }
 0xcd9   : > { %v2640_v47 = vmul.f32 %v3664_v46, %v2632_v38 }
 0xcdb   : > { %v2647_v48 = vmul.f32 %v3092_v43, %v2640_v47 }
 0xcdd   : > { %v2654_v49 = vadd.f32 %v3093_v44, %v2647_v48 }
 0xcdf   : > { %2655 = vst.msk [vmem:[%s1005_s0] sm:$0xff] %vm1068_vm1, %v2654_v49 }
 0xce0   : > { %4272 = shalt.err (!%p4269_p10)
}
 0xce1   : > { %s4273_s12 = scalar_lea.hbm %s5321_s27, 128  ;;  %s4277_s21 = scalar_lea.hbm %s5526_s9, 256 }
 0xce2   : > { %p4274_p0 = scmp.ne.s32.totalorder %s5321_s27, %s4273_s12  ;;  %p4278_p11 = scmp.lt.u32.totalorder %s5321_s27, %s5526_s9 }
 0xce3   : > { %p4279_p13 = scmp.lt.u32.totalorder %s4277_s21, %s4273_s12  ;;  %p4281_p7 = scmp.lt.u32.totalorder %s4273_s12, %s5321_s27 }
 0xce4   : > { %p4275_p5 = pnand %p4274_p0, %p5527_p6 }
 0xce5   : > { %p4280_p4 = por %p4279_p13, %p4278_p11 }
 0xce6   : > { %p4276_p12 = pneg %p4275_p5 }
 0xce7   : > { %p4282_p3 = por %p4281_p7, %p4280_p4 }
 0xce9   : > { %p4283_p8 = pnand %p4282_p3, %p4276_p12 }
 0xceb   : > { %4286 = shalt.err (!%p4283_p8)
}
 0xcec   : > { %3432 = dma.vmem_to_hbm [thread:$0]  (%p5527_p6), %s5323_s28, 128, %s5321_s27, %s2657_s5  }
 0xced PF: > { %s5528_s29 = sld [smem:[#allocation54_spill]]  ;;  %s5529_s22 = sld [smem:[#allocation50_spill]] }
 0xcee   : > { %s2683_s0 = sand.u32 1, %s4361_s2  }
 0xcef   : > { %s2684_s18 = scalar_lea.sflag [#allocation4], %s2683_s0 }
 0xcf3   : > { %p5530_p2 = scmp.ne.s32.totalorder %s5528_s29, 0  ;;  %p5531_p1 = scmp.ge.s32.totalorder %s5529_s22, 2 }
 0xcf5   : > { %p3500_p9 = pnand %p5531_p1, %p5530_p2 }
 0xcf7   : > { %4356 = dma.done.wait (!%p3500_p9), %s2684_s18, 128  }
 0xcf8   : > { %4358 = vsyncadd (!%p3500_p9), %s2684_s18, 4294967168  ;;  %s49_s28 = sadd.s32 1, %s5529_s22   ;;  %s5532_s30 = sld [smem:[#allocation53_spill]] }
 0xcf9   : > { %p46_p10 = scmp.ge.s32.totalorder %s49_s28, 4   ;;  %s5533_s27 = sld [smem:[#allocation49_spill]] }
 0xcfa   : > { %s5534_s3 = sld [smem:[#allocation52_spill]]  ;;  %s5535_s2 = smov %s4365_s25 }
 0xcfb   : > { %s5536_s25 = smov %s4369_s26  ;;  %48 = sbr.rel (!%p46_p10) target bundleno = 40 (0x28), region = 245 }
 0xcfe   : > { %s5537_s26 = smov %s5532_s30 }
 0xd02   :  { %2689 = vsyncpa [#allocation3], 1 }
 0xd03   :  { %2691 = vsyncpa [#allocation3 + $0x1], 1 }
 0xd04   :  { %2692 = vsyncpa [#allocation6], 1 }
 0xd05   :  { %2694 = vsyncpa [#allocation6 + $0x1], 1 }
 0xd06   :  { %2695 = vsyncpa [#allocation9], 1 }
 0xd07   :  { %2696 = vsyncpa [#allocation12], 1 }
 0xd08   :  { %2697 = vsyncpa [#allocation15], 1 }
 0xd09   :  { %2698 = vsyncpa [#allocation18], 1 }
 0xd0a   :  { %2699 = vsyncpa [#allocation21], 1 }
 0xd0b   :  { %2700 = vsyncpa [#allocation24], 1 }
 0xd0c   :  { %2701 = vsyncpa [#allocation27], 1 }
 0xd0d   :  { %2702 = vsyncpa [#allocation30], 1 }
 0xd0e   :  { %2703 = vsyncpa [#allocation33], 1 }
 0xd0f   :  { %2704 = vsyncpa [#allocation4], 1 }
 0xd10   :  { %2706 = vsyncpa [#allocation4 + $0x1], 1 }

</bundles_post_ra>
